<compile_context>
chip_gen: v7x
topology: tpu7x:2x2x1
jax: 0.10.0
libtpu: 0.0.40
codegen_flags: <defaults>
</compile_context>

<pallas_src>
import functools

import jax
import jax.numpy as jnp
from jax.experimental import pallas as pl
from jax.experimental.pallas import tpu as pltpu

SEQ_LEN = 7    # fixed by the module: x.repeat(1, 7, 1)
LANE = 128
SUBLANE = 8


def _round_up(n, m):
    return ((n + m - 1) // m) * m


def lstm_fc_kernel(x_ref, wih_ref, whh_ref, b_ref, wfc_ref, bfc_ref, out_ref):
    """Single-layer LSTM (PyTorch gate order i,f,g,o) + per-timestep Linear head.

    x_ref   : (Bblk, D_in)           input features (same for every timestep)
    wih_ref : (D_in, 4*HP)           W_ih^T, per-gate hidden padded to HP (128-mult)
    whh_ref : (HP, 4*HP)             W_hh^T, padded (extra rows/cols are zero)
    b_ref   : (1, 4*HP)              b_ih + b_hh (f32), padded with zeros
    wfc_ref : (HP, OP)               W_fc^T, padded with zeros
    bfc_ref : (1, OP)                b_fc (f32), padded with zeros
    out_ref : (Bblk, SEQ_LEN*OP)     batch-major emissions, lane-dense stores
    """
    HP = whh_ref.shape[0]
    OP = wfc_ref.shape[1]
    B = x_ref.shape[0]
    mxu_dtype = whh_ref.dtype            # bf16 in production, f32 for exact check

    # Input projection is identical at every timestep (x is repeated) -> hoist.
    x_gates = jnp.dot(x_ref[...].astype(mxu_dtype), wih_ref[...],
                      preferred_element_type=jnp.float32) + b_ref[...]

    whh = whh_ref[...]   # resident for the whole recurrence
    wfc = wfc_ref[...]
    bfc = bfc_ref[...]

    # h/c live in vregs in f32; padded lanes stay exactly 0 through the
    # recurrence (zero weights/bias -> gates_pad = 0 -> c_pad stays 0, h_pad 0).
    h = jnp.zeros((B, HP), jnp.float32)
    c = jnp.zeros((B, HP), jnp.float32)

    # seq_len=7 is tiny and static -> fully unrolled recurrence. Each timestep
    # streams its hidden state straight through the FC head and stores it at a
    # static 128-lane-aligned column offset (no sublane concat, short live ranges).
    for t in range(SEQ_LEN):
        gates = x_gates + jnp.dot(h.astype(mxu_dtype), whh,
                                  preferred_element_type=jnp.float32)
        # Each gate slice sits exactly on a 128-lane boundary (HP % 128 == 0).
        i_g = jax.nn.sigmoid(gates[:, 0 * HP:1 * HP])
        f_g = jax.nn.sigmoid(gates[:, 1 * HP:2 * HP])
        g_g = jnp.tanh(gates[:, 2 * HP:3 * HP])
        o_g = jax.nn.sigmoid(gates[:, 3 * HP:4 * HP])
        c = f_g * c + i_g * g_g
        h = o_g * jnp.tanh(c)
        emis = jnp.dot(h.astype(mxu_dtype), wfc,
                       preferred_element_type=jnp.float32) + bfc
        out_ref[:, t * OP:(t + 1) * OP] = emis.astype(out_ref.dtype)


def prepare_params(params, *, mxu_dtype=jnp.bfloat16):
    """One-time weight prep: transpose, fuse biases, pad to lane-aligned shapes,
    cast matmul operands to the MXU dtype (bf16 by default; f32 for exactness).
    Biases stay f32 (added after the f32-accumulated matmul)."""
    w_ih, w_hh, b_ih, b_hh, w_fc, b_fc = (
        params["w_ih"], params["w_hh"], params["b_ih"], params["b_hh"],
        params["w_fc"], params["b_fc"])

    H = w_hh.shape[1]           # w_hh: (4H, H)
    D_in = w_ih.shape[1]        # w_ih: (4H, D_in)
    O = w_fc.shape[0]           # w_fc: (O, H)
    HP = _round_up(H, LANE)
    OP = _round_up(O, LANE)

    # W_ih^T with each gate block padded from H to HP columns (zeros).
    wih_g = w_ih.reshape(4, H, D_in)
    wih_p = jnp.zeros((4, HP, D_in), jnp.float32).at[:, :H, :].set(wih_g)
    wih_t = jnp.transpose(wih_p, (2, 0, 1)).reshape(D_in, 4 * HP)

    # W_hh^T padded: rows H:HP and per-gate columns H:HP are zero.
    whh_g = w_hh.reshape(4, H, H)
    whh_p = jnp.zeros((4, HP, HP), jnp.float32).at[:, :H, :H].set(whh_g)
    whh_t = jnp.transpose(whh_p, (2, 0, 1)).reshape(HP, 4 * HP)

    # Fused LSTM bias, per-gate padded (kept f32).
    b = (b_ih + b_hh).reshape(4, H)
    b_p = jnp.zeros((4, HP), jnp.float32).at[:, :H].set(b).reshape(1, 4 * HP)

    # FC weights/bias padded (extra rows/cols zero -> padded output lanes are 0).
    wfc_t = jnp.zeros((HP, OP), jnp.float32).at[:H, :O].set(jnp.transpose(w_fc))
    bfc = jnp.zeros((1, OP), jnp.float32).at[:, :O].set(b_fc.reshape(1, O))

    return {"wih_t": wih_t.astype(mxu_dtype),
            "whh_t": whh_t.astype(mxu_dtype),
            "b": b_p,
            "wfc_t": wfc_t.astype(mxu_dtype),
            "bfc": bfc}


@functools.partial(jax.jit, static_argnames=("output_dim", "block_b"))
def lottery_model_forward(x, prep, *, output_dim, block_b=None):
    """x: (B, input_dim) float32 -> emissions (B, 7, output_dim) float32."""
    B, D_in = x.shape
    HP = prep["whh_t"].shape[0]
    OP = prep["wfc_t"].shape[1]

    # Batch block: multiple of 8 sublanes; pad B up so the grid divides evenly.
    bblk = block_b if block_b is not None else min(_round_up(B, SUBLANE), 256)
    bblk = _round_up(bblk, SUBLANE)
    b_pad = _round_up(max(B, bblk), bblk)
    grid = (b_pad // bblk,)

    x_pad = x if b_pad == B else jnp.zeros((b_pad, D_in), x.dtype).at[:B].set(x)

    # VMEM budget from the actual footprint: resident weights + double-buffered
    # x/out blocks + gate temporaries; clamped so a v7x-sized (64 MiB) core is safe.
    wbytes = jnp.dtype(prep["whh_t"].dtype).itemsize
    weights_b = (D_in * 4 * HP + HP * 4 * HP + HP * OP) * wbytes + (4 * HP + OP) * 4
    io_b = 2 * (bblk * D_in * 4) + 2 * (bblk * SEQ_LEN * OP * 4)
    tmp_b = bblk * (3 * 4 * HP + 4 * HP) * 4
    vmem_limit = int(max(16 << 20, min(48 << 20, 4 * (weights_b + io_b + tmp_b))))

    cost = pl.CostEstimate(
        flops=2 * b_pad * D_in * 4 * HP
              + SEQ_LEN * (2 * b_pad * HP * 4 * HP + 2 * b_pad * HP * OP),
        transcendentals=SEQ_LEN * b_pad * 5 * HP,
        bytes_accessed=b_pad * D_in * 4 + weights_b + b_pad * SEQ_LEN * OP * 4,
    )

    out = pl.pallas_call(
        lstm_fc_kernel,
        out_shape=jax.ShapeDtypeStruct((b_pad, SEQ_LEN * OP), jnp.float32),
        grid=grid,
        in_specs=[
            pl.BlockSpec((bblk, D_in), lambda i: (i, 0)),      # x: blocked over batch
            pl.BlockSpec((D_in, 4 * HP), lambda i: (0, 0)),    # weights: VMEM-resident
            pl.BlockSpec((HP, 4 * HP), lambda i: (0, 0)),
            pl.BlockSpec((1, 4 * HP), lambda i: (0, 0)),
            pl.BlockSpec((HP, OP), lambda i: (0, 0)),
            pl.BlockSpec((1, OP), lambda i: (0, 0)),
        ],
        out_specs=pl.BlockSpec((bblk, SEQ_LEN * OP), lambda i: (i, 0)),
        compiler_params=pltpu.CompilerParams(
            dimension_semantics=("parallel",),
            vmem_limit_bytes=vmem_limit),
        cost_estimate=cost,
    )(x_pad, prep["wih_t"], prep["whh_t"], prep["b"], prep["wfc_t"], prep["bfc"])

    # Batch-major layout: reshape is free (row-major), no HBM transpose.
    return out[:B].reshape(B, SEQ_LEN, OP)[:, :, :output_dim]


def init_params(key, input_dim, hidden_dim, output_dim):
    """Deterministic synthetic parameters with PyTorch-shaped tensors."""
    ks = jax.random.split(key, 6)
    k = 1.0 / jnp.sqrt(hidden_dim)
    u = lambda kk, shape: jax.random.uniform(kk, shape, jnp.float32, -k, k)
    return {
        "w_ih": u(ks[0], (4 * hidden_dim, input_dim)),   # nn.LSTM weight_ih_l0
        "w_hh": u(ks[1], (4 * hidden_dim, hidden_dim)),  # nn.LSTM weight_hh_l0
        "b_ih": u(ks[2], (4 * hidden_dim,)),             # nn.LSTM bias_ih_l0
        "b_hh": u(ks[3], (4 * hidden_dim,)),             # nn.LSTM bias_hh_l0
        "w_fc": u(ks[4], (output_dim, hidden_dim)),      # nn.Linear weight
        "b_fc": u(ks[5], (output_dim,)),                 # nn.Linear bias
    }


def _reference_forward(x, p):
    """Pure-JAX f32 reference of the PyTorch forward (for a sanity check)."""
    B = x.shape[0]
    H = p["w_hh"].shape[1]
    xg = x @ p["w_ih"].T + p["b_ih"] + p["b_hh"]     # (B, 4H)
    h = jnp.zeros((B, H), jnp.float32)
    c = jnp.zeros((B, H), jnp.float32)
    outs = []
    for _ in range(SEQ_LEN):
        g = xg + h @ p["w_hh"].T
        i = jax.nn.sigmoid(g[:, 0 * H:1 * H])
        f = jax.nn.sigmoid(g[:, 1 * H:2 * H])
        gg = jnp.tanh(g[:, 2 * H:3 * H])
        o = jax.nn.sigmoid(g[:, 3 * H:4 * H])
        c = f * c + i * gg
        h = o * jnp.tanh(c)
        outs.append(h @ p["w_fc"].T + p["b_fc"])
    return jnp.stack(outs, axis=1)


# TODO(synk): CRF (compute_loss / predict) is not part of forward() and is not
# implemented here.

if __name__ == "__main__":
    batch, input_dim, hidden_dim, output_dim = 10, 8, 32, 16

    key = jax.random.PRNGKey(0)
    kx, kp = jax.random.split(key)
    x = jax.random.normal(kx, (batch, input_dim), jnp.float32)
    params = init_params(kp, input_dim, hidden_dim, output_dim)

    ref = _reference_forward(x, params)

    # f32 MXU path: bit-for-bit-ish check against the pure-JAX reference.
    # block_b=8 with batch=10 -> Bpad=16, grid=(2,): exercises the batch grid,
    # the parallel dimension semantics, and the padded-row slicing.
    prep_f32 = jax.tree_util.tree_map(
        jax.block_until_ready, prepare_params(params, mxu_dtype=jnp.float32))
    out_f32 = jax.block_until_ready(
        lottery_model_forward(x, prep_f32, output_dim=output_dim, block_b=8))
    assert out_f32.shape == (batch, SEQ_LEN, output_dim)
    assert jnp.allclose(out_f32, ref, atol=1e-5, rtol=1e-5)

    # bf16 MXU operands / f32 accumulation: production config for v6e/v7x
    # (gate math and h/c stay f32, so v5e's VPU/EUP path is unchanged).
    prep_bf16 = jax.tree_util.tree_map(
        jax.block_until_ready, prepare_params(params, mxu_dtype=jnp.bfloat16))
    out_bf16 = jax.block_until_ready(
        lottery_model_forward(x, prep_bf16, output_dim=output_dim, block_b=8))
    assert out_bf16.shape == (batch, SEQ_LEN, output_dim)
    assert jnp.allclose(out_bf16, ref, atol=2e-2, rtol=2e-2)

    print("KERNEL_OK")
</pallas_src>

<mosaic_0001>
module attributes {stable_mosaic.version = 11 : i64} {
  func.func @lstm_fc_kernel(%arg0: i32, %arg1: memref<8x8xf32, #tpu.memory_space<vmem>>, %arg2: memref<8x512xf32, #tpu.memory_space<vmem>>, %arg3: memref<128x512xf32, #tpu.memory_space<vmem>>, %arg4: memref<1x512xf32, #tpu.memory_space<vmem>>, %arg5: memref<128x128xf32, #tpu.memory_space<vmem>>, %arg6: memref<1x128xf32, #tpu.memory_space<vmem>>, %arg7: memref<8x896xf32, #tpu.memory_space<vmem>>) attributes {dimension_semantics = [#tpu.dimension_semantics<parallel>], iteration_bounds = array<i64: 2>, scalar_prefetch = 0 : i64, scratch_operands = 0 : i64, tpu.core_type = #tpu.core_type<tc>, window_params = [{transform_indices = @transform_0, window_bounds = array<i64: 8, 8>}, {pipeline_mode = #tpu.pipeline_mode<synchronous>, transform_indices = @transform_1, window_bounds = array<i64: 8, 512>}, {pipeline_mode = #tpu.pipeline_mode<synchronous>, transform_indices = @transform_2, window_bounds = array<i64: 128, 512>}, {pipeline_mode = #tpu.pipeline_mode<synchronous>, transform_indices = @transform_3, window_bounds = array<i64: 1, 512>}, {pipeline_mode = #tpu.pipeline_mode<synchronous>, transform_indices = @transform_4, window_bounds = array<i64: 128, 128>}, {pipeline_mode = #tpu.pipeline_mode<synchronous>, transform_indices = @transform_5, window_bounds = array<i64: 1, 128>}, {transform_indices = @transform_6, window_bounds = array<i64: 8, 896>}]} {
    %c0 = arith.constant 0 : index
    %c0_0 = arith.constant 0 : index
    %0 = vector.load %arg1[%c0, %c0_0] : memref<8x8xf32, #tpu.memory_space<vmem>>, vector<8x8xf32>
    %c0_1 = arith.constant 0 : index
    %c0_2 = arith.constant 0 : index
    %1 = vector.load %arg2[%c0_1, %c0_2] : memref<8x512xf32, #tpu.memory_space<vmem>>, vector<8x512xf32>
    %cst = arith.constant dense<0.000000e+00> : vector<8x512xf32>
    %2 = tpu.matmul %0, %1, %cst {dimension_numbers = #tpu.dot_dimension_numbers<[1], [0], [0], [1], [0, 0, 1, 1], [], []>} : vector<8x8xf32>, vector<8x512xf32>, vector<8x512xf32> -> vector<8x512xf32>
    %c0_3 = arith.constant 0 : index
    %c0_4 = arith.constant 0 : index
    %3 = vector.load %arg4[%c0_3, %c0_4] : memref<1x512xf32, #tpu.memory_space<vmem>>, vector<1x512xf32>
    %4 = vector.broadcast %3 : vector<1x512xf32> to vector<8x512xf32>
    %5 = arith.addf %2, %4 : vector<8x512xf32>
    %c0_5 = arith.constant 0 : index
    %c0_6 = arith.constant 0 : index
    %6 = vector.load %arg3[%c0_5, %c0_6] : memref<128x512xf32, #tpu.memory_space<vmem>>, vector<128x512xf32>
    %c0_7 = arith.constant 0 : index
    %c0_8 = arith.constant 0 : index
    %7 = vector.load %arg5[%c0_7, %c0_8] : memref<128x128xf32, #tpu.memory_space<vmem>>, vector<128x128xf32>
    %c0_9 = arith.constant 0 : index
    %c0_10 = arith.constant 0 : index
    %8 = vector.load %arg6[%c0_9, %c0_10] : memref<1x128xf32, #tpu.memory_space<vmem>>, vector<1x128xf32>
    %cst_11 = arith.constant 0.000000e+00 : f32
    %9 = vector.broadcast %cst_11 : f32 to vector<8x128xf32>
    %cst_12 = arith.constant 0.000000e+00 : f32
    %10 = vector.broadcast %cst_12 : f32 to vector<8x128xf32>
    %cst_13 = arith.constant dense<0.000000e+00> : vector<8x512xf32>
    %11 = tpu.matmul %9, %6, %cst_13 {dimension_numbers = #tpu.dot_dimension_numbers<[1], [0], [0], [1], [0, 0, 1, 1], [], []>} : vector<8x128xf32>, vector<128x512xf32>, vector<8x512xf32> -> vector<8x512xf32>
    %12 = arith.addf %5, %11 : vector<8x512xf32>
    %13 = vector.extract_strided_slice %12 {offsets = [0, 0], sizes = [8, 128], strides = [1, 1]} : vector<8x512xf32> to vector<8x128xf32>
    %14 = arith.negf %13 : vector<8x128xf32>
    %15 = math.exp %14 : vector<8x128xf32>
    %cst_14 = arith.constant 1.000000e+00 : f32
    %16 = vector.broadcast %cst_14 : f32 to vector<8x128xf32>
    %17 = arith.addf %16, %15 : vector<8x128xf32>
    %18 = arith.divf %16, %17 : vector<8x128xf32>
    %19 = vector.extract_strided_slice %12 {offsets = [0, 128], sizes = [8, 128], strides = [1, 1]} : vector<8x512xf32> to vector<8x128xf32>
    %20 = arith.negf %19 : vector<8x128xf32>
    %21 = math.exp %20 : vector<8x128xf32>
    %cst_15 = arith.constant 1.000000e+00 : f32
    %22 = vector.broadcast %cst_15 : f32 to vector<8x128xf32>
    %23 = arith.addf %22, %21 : vector<8x128xf32>
    %24 = arith.divf %22, %23 : vector<8x128xf32>
    %25 = vector.extract_strided_slice %12 {offsets = [0, 256], sizes = [8, 128], strides = [1, 1]} : vector<8x512xf32> to vector<8x128xf32>
    %26 = math.tanh %25 : vector<8x128xf32>
    %27 = vector.extract_strided_slice %12 {offsets = [0, 384], sizes = [8, 128], strides = [1, 1]} : vector<8x512xf32> to vector<8x128xf32>
    %28 = arith.negf %27 : vector<8x128xf32>
    %29 = math.exp %28 : vector<8x128xf32>
    %cst_16 = arith.constant 1.000000e+00 : f32
    %30 = vector.broadcast %cst_16 : f32 to vector<8x128xf32>
    %31 = arith.addf %30, %29 : vector<8x128xf32>
    %32 = arith.divf %30, %31 : vector<8x128xf32>
    %33 = arith.mulf %24, %10 : vector<8x128xf32>
    %34 = arith.mulf %18, %26 : vector<8x128xf32>
    %35 = arith.addf %33, %34 : vector<8x128xf32>
    %36 = math.tanh %35 : vector<8x128xf32>
    %37 = arith.mulf %32, %36 : vector<8x128xf32>
    %cst_17 = arith.constant dense<0.000000e+00> : vector<8x128xf32>
    %38 = tpu.matmul %37, %7, %cst_17 {dimension_numbers = #tpu.dot_dimension_numbers<[1], [0], [0], [1], [0, 0, 1, 1], [], []>} : vector<8x128xf32>, vector<128x128xf32>, vector<8x128xf32> -> vector<8x128xf32>
    %39 = vector.broadcast %8 : vector<1x128xf32> to vector<8x128xf32>
    %40 = arith.addf %38, %39 : vector<8x128xf32>
    %c0_18 = arith.constant 0 : index
    %c0_19 = arith.constant 0 : index
    %41 = vector.load %arg7[%c0_18, %c0_19] : memref<8x896xf32, #tpu.memory_space<vmem>>, vector<8x128xf32>
    tpu.vector_store %arg7[%c0_18, %c0_19], %40 {strides = array<i32>} : memref<8x896xf32, #tpu.memory_space<vmem>>, vector<8x128xf32>,
    %cst_20 = arith.constant dense<0.000000e+00> : vector<8x512xf32>
    %42 = tpu.matmul %37, %6, %cst_20 {dimension_numbers = #tpu.dot_dimension_numbers<[1], [0], [0], [1], [0, 0, 1, 1], [], []>} : vector<8x128xf32>, vector<128x512xf32>, vector<8x512xf32> -> vector<8x512xf32>
    %43 = arith.addf %5, %42 : vector<8x512xf32>
    %44 = vector.extract_strided_slice %43 {offsets = [0, 0], sizes = [8, 128], strides = [1, 1]} : vector<8x512xf32> to vector<8x128xf32>
    %45 = arith.negf %44 : vector<8x128xf32>
    %46 = math.exp %45 : vector<8x128xf32>
    %cst_21 = arith.constant 1.000000e+00 : f32
    %47 = vector.broadcast %cst_21 : f32 to vector<8x128xf32>
    %48 = arith.addf %47, %46 : vector<8x128xf32>
    %49 = arith.divf %47, %48 : vector<8x128xf32>
    %50 = vector.extract_strided_slice %43 {offsets = [0, 128], sizes = [8, 128], strides = [1, 1]} : vector<8x512xf32> to vector<8x128xf32>
    %51 = arith.negf %50 : vector<8x128xf32>
    %52 = math.exp %51 : vector<8x128xf32>
    %cst_22 = arith.constant 1.000000e+00 : f32
    %53 = vector.broadcast %cst_22 : f32 to vector<8x128xf32>
    %54 = arith.addf %53, %52 : vector<8x128xf32>
    %55 = arith.divf %53, %54 : vector<8x128xf32>
    %56 = vector.extract_strided_slice %43 {offsets = [0, 256], sizes = [8, 128], strides = [1, 1]} : vector<8x512xf32> to vector<8x128xf32>
    %57 = math.tanh %56 : vector<8x128xf32>
    %58 = vector.extract_strided_slice %43 {offsets = [0, 384], sizes = [8, 128], strides = [1, 1]} : vector<8x512xf32> to vector<8x128xf32>
    %59 = arith.negf %58 : vector<8x128xf32>
    %60 = math.exp %59 : vector<8x128xf32>
    %cst_23 = arith.constant 1.000000e+00 : f32
    %61 = vector.broadcast %cst_23 : f32 to vector<8x128xf32>
    %62 = arith.addf %61, %60 : vector<8x128xf32>
    %63 = arith.divf %61, %62 : vector<8x128xf32>
    %64 = arith.mulf %55, %35 : vector<8x128xf32>
    %65 = arith.mulf %49, %57 : vector<8x128xf32>
    %66 = arith.addf %64, %65 : vector<8x128xf32>
    %67 = math.tanh %66 : vector<8x128xf32>
    %68 = arith.mulf %63, %67 : vector<8x128xf32>
    %cst_24 = arith.constant dense<0.000000e+00> : vector<8x128xf32>
    %69 = tpu.matmul %68, %7, %cst_24 {dimension_numbers = #tpu.dot_dimension_numbers<[1], [0], [0], [1], [0, 0, 1, 1], [], []>} : vector<8x128xf32>, vector<128x128xf32>, vector<8x128xf32> -> vector<8x128xf32>
    %70 = vector.broadcast %8 : vector<1x128xf32> to vector<8x128xf32>
    %71 = arith.addf %69, %70 : vector<8x128xf32>
    %c0_25 = arith.constant 0 : index
    %c128 = arith.constant 128 : index
    %72 = vector.load %arg7[%c0_25, %c128] : memref<8x896xf32, #tpu.memory_space<vmem>>, vector<8x128xf32>
    tpu.vector_store %arg7[%c0_25, %c128], %71 {strides = array<i32>} : memref<8x896xf32, #tpu.memory_space<vmem>>, vector<8x128xf32>,
    %cst_26 = arith.constant dense<0.000000e+00> : vector<8x512xf32>
    %73 = tpu.matmul %68, %6, %cst_26 {dimension_numbers = #tpu.dot_dimension_numbers<[1], [0], [0], [1], [0, 0, 1, 1], [], []>} : vector<8x128xf32>, vector<128x512xf32>, vector<8x512xf32> -> vector<8x512xf32>
    %74 = arith.addf %5, %73 : vector<8x512xf32>
    %75 = vector.extract_strided_slice %74 {offsets = [0, 0], sizes = [8, 128], strides = [1, 1]} : vector<8x512xf32> to vector<8x128xf32>
    %76 = arith.negf %75 : vector<8x128xf32>
    %77 = math.exp %76 : vector<8x128xf32>
    %cst_27 = arith.constant 1.000000e+00 : f32
    %78 = vector.broadcast %cst_27 : f32 to vector<8x128xf32>
    %79 = arith.addf %78, %77 : vector<8x128xf32>
    %80 = arith.divf %78, %79 : vector<8x128xf32>
    %81 = vector.extract_strided_slice %74 {offsets = [0, 128], sizes = [8, 128], strides = [1, 1]} : vector<8x512xf32> to vector<8x128xf32>
    %82 = arith.negf %81 : vector<8x128xf32>
    %83 = math.exp %82 : vector<8x128xf32>
    %cst_28 = arith.constant 1.000000e+00 : f32
    %84 = vector.broadcast %cst_28 : f32 to vector<8x128xf32>
    %85 = arith.addf %84, %83 : vector<8x128xf32>
    %86 = arith.divf %84, %85 : vector<8x128xf32>
    %87 = vector.extract_strided_slice %74 {offsets = [0, 256], sizes = [8, 128], strides = [1, 1]} : vector<8x512xf32> to vector<8x128xf32>
    %88 = math.tanh %87 : vector<8x128xf32>
    %89 = vector.extract_strided_slice %74 {offsets = [0, 384], sizes = [8, 128], strides = [1, 1]} : vector<8x512xf32> to vector<8x128xf32>
    %90 = arith.negf %89 : vector<8x128xf32>
    %91 = math.exp %90 : vector<8x128xf32>
    %cst_29 = arith.constant 1.000000e+00 : f32
    %92 = vector.broadcast %cst_29 : f32 to vector<8x128xf32>
    %93 = arith.addf %92, %91 : vector<8x128xf32>
    %94 = arith.divf %92, %93 : vector<8x128xf32>
    %95 = arith.mulf %86, %66 : vector<8x128xf32>
    %96 = arith.mulf %80, %88 : vector<8x128xf32>
    %97 = arith.addf %95, %96 : vector<8x128xf32>
    %98 = math.tanh %97 : vector<8x128xf32>
    %99 = arith.mulf %94, %98 : vector<8x128xf32>
    %cst_30 = arith.constant dense<0.000000e+00> : vector<8x128xf32>
    %100 = tpu.matmul %99, %7, %cst_30 {dimension_numbers = #tpu.dot_dimension_numbers<[1], [0], [0], [1], [0, 0, 1, 1], [], []>} : vector<8x128xf32>, vector<128x128xf32>, vector<8x128xf32> -> vector<8x128xf32>
    %101 = vector.broadcast %8 : vector<1x128xf32> to vector<8x128xf32>
    %102 = arith.addf %100, %101 : vector<8x128xf32>
    %c0_31 = arith.constant 0 : index
    %c256 = arith.constant 256 : index
    %103 = vector.load %arg7[%c0_31, %c256] : memref<8x896xf32, #tpu.memory_space<vmem>>, vector<8x128xf32>
    tpu.vector_store %arg7[%c0_31, %c256], %102 {strides = array<i32>} : memref<8x896xf32, #tpu.memory_space<vmem>>, vector<8x128xf32>,
    %cst_32 = arith.constant dense<0.000000e+00> : vector<8x512xf32>
    %104 = tpu.matmul %99, %6, %cst_32 {dimension_numbers = #tpu.dot_dimension_numbers<[1], [0], [0], [1], [0, 0, 1, 1], [], []>} : vector<8x128xf32>, vector<128x512xf32>, vector<8x512xf32> -> vector<8x512xf32>
    %105 = arith.addf %5, %104 : vector<8x512xf32>
    %106 = vector.extract_strided_slice %105 {offsets = [0, 0], sizes = [8, 128], strides = [1, 1]} : vector<8x512xf32> to vector<8x128xf32>
    %107 = arith.negf %106 : vector<8x128xf32>
    %108 = math.exp %107 : vector<8x128xf32>
    %cst_33 = arith.constant 1.000000e+00 : f32
    %109 = vector.broadcast %cst_33 : f32 to vector<8x128xf32>
    %110 = arith.addf %109, %108 : vector<8x128xf32>
    %111 = arith.divf %109, %110 : vector<8x128xf32>
    %112 = vector.extract_strided_slice %105 {offsets = [0, 128], sizes = [8, 128], strides = [1, 1]} : vector<8x512xf32> to vector<8x128xf32>
    %113 = arith.negf %112 : vector<8x128xf32>
    %114 = math.exp %113 : vector<8x128xf32>
    %cst_34 = arith.constant 1.000000e+00 : f32
    %115 = vector.broadcast %cst_34 : f32 to vector<8x128xf32>
    %116 = arith.addf %115, %114 : vector<8x128xf32>
    %117 = arith.divf %115, %116 : vector<8x128xf32>
    %118 = vector.extract_strided_slice %105 {offsets = [0, 256], sizes = [8, 128], strides = [1, 1]} : vector<8x512xf32> to vector<8x128xf32>
    %119 = math.tanh %118 : vector<8x128xf32>
    %120 = vector.extract_strided_slice %105 {offsets = [0, 384], sizes = [8, 128], strides = [1, 1]} : vector<8x512xf32> to vector<8x128xf32>
    %121 = arith.negf %120 : vector<8x128xf32>
    %122 = math.exp %121 : vector<8x128xf32>
    %cst_35 = arith.constant 1.000000e+00 : f32
    %123 = vector.broadcast %cst_35 : f32 to vector<8x128xf32>
    %124 = arith.addf %123, %122 : vector<8x128xf32>
    %125 = arith.divf %123, %124 : vector<8x128xf32>
    %126 = arith.mulf %117, %97 : vector<8x128xf32>
    %127 = arith.mulf %111, %119 : vector<8x128xf32>
    %128 = arith.addf %126, %127 : vector<8x128xf32>
    %129 = math.tanh %128 : vector<8x128xf32>
    %130 = arith.mulf %125, %129 : vector<8x128xf32>
    %cst_36 = arith.constant dense<0.000000e+00> : vector<8x128xf32>
    %131 = tpu.matmul %130, %7, %cst_36 {dimension_numbers = #tpu.dot_dimension_numbers<[1], [0], [0], [1], [0, 0, 1, 1], [], []>} : vector<8x128xf32>, vector<128x128xf32>, vector<8x128xf32> -> vector<8x128xf32>
    %132 = vector.broadcast %8 : vector<1x128xf32> to vector<8x128xf32>
    %133 = arith.addf %131, %132 : vector<8x128xf32>
    %c0_37 = arith.constant 0 : index
    %c384 = arith.constant 384 : index
    %134 = vector.load %arg7[%c0_37, %c384] : memref<8x896xf32, #tpu.memory_space<vmem>>, vector<8x128xf32>
    tpu.vector_store %arg7[%c0_37, %c384], %133 {strides = array<i32>} : memref<8x896xf32, #tpu.memory_space<vmem>>, vector<8x128xf32>,
    %cst_38 = arith.constant dense<0.000000e+00> : vector<8x512xf32>
    %135 = tpu.matmul %130, %6, %cst_38 {dimension_numbers = #tpu.dot_dimension_numbers<[1], [0], [0], [1], [0, 0, 1, 1], [], []>} : vector<8x128xf32>, vector<128x512xf32>, vector<8x512xf32> -> vector<8x512xf32>
    %136 = arith.addf %5, %135 : vector<8x512xf32>
    %137 = vector.extract_strided_slice %136 {offsets = [0, 0], sizes = [8, 128], strides = [1, 1]} : vector<8x512xf32> to vector<8x128xf32>
    %138 = arith.negf %137 : vector<8x128xf32>
    %139 = math.exp %138 : vector<8x128xf32>
    %cst_39 = arith.constant 1.000000e+00 : f32
    %140 = vector.broadcast %cst_39 : f32 to vector<8x128xf32>
    %141 = arith.addf %140, %139 : vector<8x128xf32>
    %142 = arith.divf %140, %141 : vector<8x128xf32>
    %143 = vector.extract_strided_slice %136 {offsets = [0, 128], sizes = [8, 128], strides = [1, 1]} : vector<8x512xf32> to vector<8x128xf32>
    %144 = arith.negf %143 : vector<8x128xf32>
    %145 = math.exp %144 : vector<8x128xf32>
    %cst_40 = arith.constant 1.000000e+00 : f32
    %146 = vector.broadcast %cst_40 : f32 to vector<8x128xf32>
    %147 = arith.addf %146, %145 : vector<8x128xf32>
    %148 = arith.divf %146, %147 : vector<8x128xf32>
    %149 = vector.extract_strided_slice %136 {offsets = [0, 256], sizes = [8, 128], strides = [1, 1]} : vector<8x512xf32> to vector<8x128xf32>
    %150 = math.tanh %149 : vector<8x128xf32>
    %151 = vector.extract_strided_slice %136 {offsets = [0, 384], sizes = [8, 128], strides = [1, 1]} : vector<8x512xf32> to vector<8x128xf32>
    %152 = arith.negf %151 : vector<8x128xf32>
    %153 = math.exp %152 : vector<8x128xf32>
    %cst_41 = arith.constant 1.000000e+00 : f32
    %154 = vector.broadcast %cst_41 : f32 to vector<8x128xf32>
    %155 = arith.addf %154, %153 : vector<8x128xf32>
    %156 = arith.divf %154, %155 : vector<8x128xf32>
    %157 = arith.mulf %148, %128 : vector<8x128xf32>
    %158 = arith.mulf %142, %150 : vector<8x128xf32>
    %159 = arith.addf %157, %158 : vector<8x128xf32>
    %160 = math.tanh %159 : vector<8x128xf32>
    %161 = arith.mulf %156, %160 : vector<8x128xf32>
    %cst_42 = arith.constant dense<0.000000e+00> : vector<8x128xf32>
    %162 = tpu.matmul %161, %7, %cst_42 {dimension_numbers = #tpu.dot_dimension_numbers<[1], [0], [0], [1], [0, 0, 1, 1], [], []>} : vector<8x128xf32>, vector<128x128xf32>, vector<8x128xf32> -> vector<8x128xf32>
    %163 = vector.broadcast %8 : vector<1x128xf32> to vector<8x128xf32>
    %164 = arith.addf %162, %163 : vector<8x128xf32>
    %c0_43 = arith.constant 0 : index
    %c512 = arith.constant 512 : index
    %165 = vector.load %arg7[%c0_43, %c512] : memref<8x896xf32, #tpu.memory_space<vmem>>, vector<8x128xf32>
    tpu.vector_store %arg7[%c0_43, %c512], %164 {strides = array<i32>} : memref<8x896xf32, #tpu.memory_space<vmem>>, vector<8x128xf32>,
    %cst_44 = arith.constant dense<0.000000e+00> : vector<8x512xf32>
    %166 = tpu.matmul %161, %6, %cst_44 {dimension_numbers = #tpu.dot_dimension_numbers<[1], [0], [0], [1], [0, 0, 1, 1], [], []>} : vector<8x128xf32>, vector<128x512xf32>, vector<8x512xf32> -> vector<8x512xf32>
    %167 = arith.addf %5, %166 : vector<8x512xf32>
    %168 = vector.extract_strided_slice %167 {offsets = [0, 0], sizes = [8, 128], strides = [1, 1]} : vector<8x512xf32> to vector<8x128xf32>
    %169 = arith.negf %168 : vector<8x128xf32>
    %170 = math.exp %169 : vector<8x128xf32>
    %cst_45 = arith.constant 1.000000e+00 : f32
    %171 = vector.broadcast %cst_45 : f32 to vector<8x128xf32>
    %172 = arith.addf %171, %170 : vector<8x128xf32>
    %173 = arith.divf %171, %172 : vector<8x128xf32>
    %174 = vector.extract_strided_slice %167 {offsets = [0, 128], sizes = [8, 128], strides = [1, 1]} : vector<8x512xf32> to vector<8x128xf32>
    %175 = arith.negf %174 : vector<8x128xf32>
    %176 = math.exp %175 : vector<8x128xf32>
    %cst_46 = arith.constant 1.000000e+00 : f32
    %177 = vector.broadcast %cst_46 : f32 to vector<8x128xf32>
    %178 = arith.addf %177, %176 : vector<8x128xf32>
    %179 = arith.divf %177, %178 : vector<8x128xf32>
    %180 = vector.extract_strided_slice %167 {offsets = [0, 256], sizes = [8, 128], strides = [1, 1]} : vector<8x512xf32> to vector<8x128xf32>
    %181 = math.tanh %180 : vector<8x128xf32>
    %182 = vector.extract_strided_slice %167 {offsets = [0, 384], sizes = [8, 128], strides = [1, 1]} : vector<8x512xf32> to vector<8x128xf32>
    %183 = arith.negf %182 : vector<8x128xf32>
    %184 = math.exp %183 : vector<8x128xf32>
    %cst_47 = arith.constant 1.000000e+00 : f32
    %185 = vector.broadcast %cst_47 : f32 to vector<8x128xf32>
    %186 = arith.addf %185, %184 : vector<8x128xf32>
    %187 = arith.divf %185, %186 : vector<8x128xf32>
    %188 = arith.mulf %179, %159 : vector<8x128xf32>
    %189 = arith.mulf %173, %181 : vector<8x128xf32>
    %190 = arith.addf %188, %189 : vector<8x128xf32>
    %191 = math.tanh %190 : vector<8x128xf32>
    %192 = arith.mulf %187, %191 : vector<8x128xf32>
    %cst_48 = arith.constant dense<0.000000e+00> : vector<8x128xf32>
    %193 = tpu.matmul %192, %7, %cst_48 {dimension_numbers = #tpu.dot_dimension_numbers<[1], [0], [0], [1], [0, 0, 1, 1], [], []>} : vector<8x128xf32>, vector<128x128xf32>, vector<8x128xf32> -> vector<8x128xf32>
    %194 = vector.broadcast %8 : vector<1x128xf32> to vector<8x128xf32>
    %195 = arith.addf %193, %194 : vector<8x128xf32>
    %c0_49 = arith.constant 0 : index
    %c640 = arith.constant 640 : index
    %196 = vector.load %arg7[%c0_49, %c640] : memref<8x896xf32, #tpu.memory_space<vmem>>, vector<8x128xf32>
    tpu.vector_store %arg7[%c0_49, %c640], %195 {strides = array<i32>} : memref<8x896xf32, #tpu.memory_space<vmem>>, vector<8x128xf32>,
    %cst_50 = arith.constant dense<0.000000e+00> : vector<8x512xf32>
    %197 = tpu.matmul %192, %6, %cst_50 {dimension_numbers = #tpu.dot_dimension_numbers<[1], [0], [0], [1], [0, 0, 1, 1], [], []>} : vector<8x128xf32>, vector<128x512xf32>, vector<8x512xf32> -> vector<8x512xf32>
    %198 = arith.addf %5, %197 : vector<8x512xf32>
    %199 = vector.extract_strided_slice %198 {offsets = [0, 0], sizes = [8, 128], strides = [1, 1]} : vector<8x512xf32> to vector<8x128xf32>
    %200 = arith.negf %199 : vector<8x128xf32>
    %201 = math.exp %200 : vector<8x128xf32>
    %cst_51 = arith.constant 1.000000e+00 : f32
    %202 = vector.broadcast %cst_51 : f32 to vector<8x128xf32>
    %203 = arith.addf %202, %201 : vector<8x128xf32>
    %204 = arith.divf %202, %203 : vector<8x128xf32>
    %205 = vector.extract_strided_slice %198 {offsets = [0, 128], sizes = [8, 128], strides = [1, 1]} : vector<8x512xf32> to vector<8x128xf32>
    %206 = arith.negf %205 : vector<8x128xf32>
    %207 = math.exp %206 : vector<8x128xf32>
    %cst_52 = arith.constant 1.000000e+00 : f32
    %208 = vector.broadcast %cst_52 : f32 to vector<8x128xf32>
    %209 = arith.addf %208, %207 : vector<8x128xf32>
    %210 = arith.divf %208, %209 : vector<8x128xf32>
    %211 = vector.extract_strided_slice %198 {offsets = [0, 256], sizes = [8, 128], strides = [1, 1]} : vector<8x512xf32> to vector<8x128xf32>
    %212 = math.tanh %211 : vector<8x128xf32>
    %213 = vector.extract_strided_slice %198 {offsets = [0, 384], sizes = [8, 128], strides = [1, 1]} : vector<8x512xf32> to vector<8x128xf32>
    %214 = arith.negf %213 : vector<8x128xf32>
    %215 = math.exp %214 : vector<8x128xf32>
    %cst_53 = arith.constant 1.000000e+00 : f32
    %216 = vector.broadcast %cst_53 : f32 to vector<8x128xf32>
    %217 = arith.addf %216, %215 : vector<8x128xf32>
    %218 = arith.divf %216, %217 : vector<8x128xf32>
    %219 = arith.mulf %210, %190 : vector<8x128xf32>
    %220 = arith.mulf %204, %212 : vector<8x128xf32>
    %221 = arith.addf %219, %220 : vector<8x128xf32>
    %222 = math.tanh %221 : vector<8x128xf32>
    %223 = arith.mulf %218, %222 : vector<8x128xf32>
    %cst_54 = arith.constant dense<0.000000e+00> : vector<8x128xf32>
    %224 = tpu.matmul %223, %7, %cst_54 {dimension_numbers = #tpu.dot_dimension_numbers<[1], [0], [0], [1], [0, 0, 1, 1], [], []>} : vector<8x128xf32>, vector<128x128xf32>, vector<8x128xf32> -> vector<8x128xf32>
    %225 = vector.broadcast %8 : vector<1x128xf32> to vector<8x128xf32>
    %226 = arith.addf %224, %225 : vector<8x128xf32>
    %c0_55 = arith.constant 0 : index
    %c768 = arith.constant 768 : index
    %227 = vector.load %arg7[%c0_55, %c768] : memref<8x896xf32, #tpu.memory_space<vmem>>, vector<8x128xf32>
    tpu.vector_store %arg7[%c0_55, %c768], %226 {strides = array<i32>} : memref<8x896xf32, #tpu.memory_space<vmem>>, vector<8x128xf32>,
    return
  }
  func.func @transform_0(%arg0: i32) -> (i32, i32) {
    %c0_i32 = arith.constant 0 : i32
    %c0_i32_0 = arith.constant 0 : i32
    return %arg0, %c0_i32 : i32, i32
  }
  func.func @transform_1(%arg0: i32) -> (i32, i32) {
    %c0_i32 = arith.constant 0 : i32
    %c0_i32_0 = arith.constant 0 : i32
    %c0_i32_1 = arith.constant 0 : i32
    return %c0_i32, %c0_i32_0 : i32, i32
  }
  func.func @transform_2(%arg0: i32) -> (i32, i32) {
    %c0_i32 = arith.constant 0 : i32
    %c0_i32_0 = arith.constant 0 : i32
    %c0_i32_1 = arith.constant 0 : i32
    return %c0_i32, %c0_i32_0 : i32, i32
  }
  func.func @transform_3(%arg0: i32) -> (i32, i32) {
    %c0_i32 = arith.constant 0 : i32
    %c0_i32_0 = arith.constant 0 : i32
    %c0_i32_1 = arith.constant 0 : i32
    return %c0_i32, %c0_i32_0 : i32, i32
  }
  func.func @transform_4(%arg0: i32) -> (i32, i32) {
    %c0_i32 = arith.constant 0 : i32
    %c0_i32_0 = arith.constant 0 : i32
    %c0_i32_1 = arith.constant 0 : i32
    return %c0_i32, %c0_i32_0 : i32, i32
  }
  func.func @transform_5(%arg0: i32) -> (i32, i32) {
    %c0_i32 = arith.constant 0 : i32
    %c0_i32_0 = arith.constant 0 : i32
    %c0_i32_1 = arith.constant 0 : i32
    return %c0_i32, %c0_i32_0 : i32, i32
  }
  func.func @transform_6(%arg0: i32) -> (i32, i32) {
    %c0_i32 = arith.constant 0 : i32
    %c0_i32_0 = arith.constant 0 : i32
    return %arg0, %c0_i32 : i32, i32
  }
}

</mosaic_0001>

<bundles_post_ra>
// kernel: lottery_model_forward.1
= control target key start
LH: loop header
LB: loop body
LE: loop exit
PB: predicated region body
PF: predicated region fallthrough
CT: control target
= control target key end

     0   :  { %11 = vsyncpa [#allocation3], 0  ;;  %s4228_s0 = inlined_call_operand.vmem [shape: f32[16,8], index: 0, kind: input, shape index: {}]   ;;  %s4229_s1 = inlined_call_operand.vmem [shape: f32[8,512], index: 1, kind: input, shape index: {}]   ;;  %s4230_s2 = inlined_call_operand.hbm [shape: f32[128,512], index: 2, kind: input, shape index: {}]   ;;  %s4231_s3 = inlined_call_operand.vmem [shape: f32[1,512], index: 3, kind: input, shape index: {}]   ;;  %s4232_s4 = inlined_call_operand.hbm [shape: f32[128,128], index: 4, kind: input, shape index: {}]   ;;  %s4233_s5 = inlined_call_operand.vmem [shape: f32[1,128], index: 5, kind: input, shape index: {}]   ;;  %s4234_s6 = inlined_call_operand.vmem [shape: f32[16,896], index: 6, kind: output, shape index: {}]  }
   0x1   :  { %12 = vsyncpa [#allocation5], 0  ;;  %s3585_s21 = smov 0  }
   0x2 LB: > { %s3541_s22 = smov [#allocation2]   ;;  %s3591_s24 = sadd.s32 4294967295, %s3539_s21   ;;  %s3539_s21 = sphi %s3585_s21, %s18_s21  }
   0x3   : > { %s195_s23 = sshll.u32 %s3541_s22, 4  ;;  %p2305_p0 = scmp.ge.s32.totalorder %s3539_s21, 1  ;;  %s196_s23 = int_to_ptr.vmem [resolvable:$true] %s195_s23 }
   0x4   : > { %p180_p1 = scmp.lt.s32.totalorder %s3539_s21, 3  ;;  %p4235_p3 = scmp.eq.s32.totalorder %s3591_s24, 0 }
   0x5   : > { %s3542_s26 = smov [#allocation4]   ;;  %s3469_s7 = scalar_lea.hbm %s4230_s2, 8192 }
   0x6   : > { %p3595_p2 = pnand %p2305_p0, %p180_p1  ;;  %s211_s27 = sshll.u32 %s3542_s26, 4  ;;  %s3608_s27 = int_to_ptr.vmem [resolvable:$true] %s211_s27 }
   0x7   : > { %p3470_p6 = scmp.ne.s32.totalorder %s4230_s2, %s3469_s7  ;;  %p3476_p10 = scmp.lt.u32.totalorder %s3469_s7, %s4230_s2 }
   0x8   : > { %s4239_s25 = scalar_select %p3595_p2, 1, 0 }
   0x9   : > { %p3329_p4 = pneg %p3595_p2 }
   0xb   : > { %p3604_p5 = pnand %p4235_p3, %p3329_p4 }
   0xd   : > { %p3471_p7 = pneg %p3604_p5 }
   0xf   : > { %p3472_p8 = pnand %p3471_p7, %p3470_p6 }
  0x11   : > { %p3473_p9 = pneg %p3472_p8 }
  0x13   : > { %p3478_p11 = pnand %p3476_p10, %p3473_p9 }
  0x15   : > { %3481 = shalt.err (!%p3478_p11)
}
  0x16   : > { %s3482_s12 = scalar_lea.vmem %s196_s23, 8192  ;;  %p3490_p1 = scmp.lt.s32.totalorder %s196_s23, %s196_s23 }
  0x17   : > { %p3483_p12 = scmp.ne.s32.totalorder %s196_s23, %s3482_s12  ;;  %p3491_p4 = scmp.lt.s32.totalorder %s3482_s12, %s3482_s12 }
  0x19   : > { %p3485_p13 = pnand %p3483_p12, %p3471_p7  ;;  %p3492_p3 = por %p3491_p4, %p3490_p1 }
  0x1b   : > { %p3486_p0 = pneg %p3485_p13 }
  0x1d   : > { %p3493_p2 = pnand %p3492_p3, %p3486_p0 }
  0x1f   : > { %3496 = shalt.err (!%p3493_p2)
}
  0x20   : > { %s3543_s13 = smov 512   ;;  %s3544_s14 = smov 32  }
  0x21   : > { %3332 = dma.hbm_to_vmem [thread:$0]  (!%p3604_p5), %s4230_s2, 8192, %s196_s23, [#allocation3], %s3543_s13, %s3543_s13, %s3544_s14  }
  0x22   : > { %s3497_s19 = scalar_lea.hbm %s4232_s4, 2048 }
  0x23   : > { %p3498_p6 = scmp.ne.s32.totalorder %s4232_s4, %s3497_s19  ;;  %p3504_p8 = scmp.lt.u32.totalorder %s3497_s19, %s4232_s4 }
  0x25   : > { %p3500_p2 = pnand %p3498_p6, %p3471_p7 }
  0x27   : > { %p3501_p3 = pneg %p3500_p2 }
  0x29   : > { %p3506_p9 = pnand %p3504_p8, %p3501_p3 }
  0x2b   : > { %3509 = shalt.err (!%p3506_p9)
}
  0x2c   : > { %s3510_s23 = scalar_lea.vmem %s3608_s27, 2048  ;;  %p3518_p13 = scmp.lt.s32.totalorder %s3608_s27, %s3608_s27 }
  0x2d   : > { %p3511_p10 = scmp.ne.s32.totalorder %s3608_s27, %s3510_s23  ;;  %p3519_p0 = scmp.lt.s32.totalorder %s3510_s23, %s3510_s23 }
  0x2f   : > { %p3513_p11 = pnand %p3511_p10, %p3471_p7  ;;  %p3520_p1 = por %p3519_p0, %p3518_p13 }
  0x31   : > { %p3514_p12 = pneg %p3513_p11 }
  0x33   : > { %p3521_p4 = pnand %p3520_p1, %p3514_p12 }
  0x35   : > { %3524 = shalt.err (!%p3521_p4)
}
  0x36   : > { %s3545_s30 = smov 128   ;;  %s3546_s7 = smov 8  }
  0x37   : > { %3335 = dma.hbm_to_vmem [thread:$0]  (!%p3604_p5), %s4232_s4, 2048, %s3608_s27, [#allocation5], %s3545_s30, %s3545_s30, %s3546_s7  }
  0x38   : > { %p4241_p6 = scmp.ne.s32.totalorder %s4239_s25, 0 }
  0x39   : > { %p4242_p7 = scmp.eq.s32.totalorder (!%p4241_p6), %s3591_s24, 0 }
  0x3a   : > { %237 = sbr.rel (%p4241_p6) target bundleno = 2230 (0x8b6), region = 44 }
  0x41   : > { %3530 = dma.done.wait (%p4242_p7), [#allocation3], 8192   ;;  %p4243_p2 = pmov %p4242_p7 }
  0x43   : > { %3532 = vsyncadd (%p4243_p2), [#allocation3], 4294959104  ;;  %p4244_p3 = pmov %p4243_p2 }
  0x44   : > { %p4245_p8 = pmov %p4243_p2 }
  0x45   : > { %3534 = dma.done.wait (%p4244_p3), [#allocation5], 2048  }
  0x46   : > { %3536 = vsyncadd (%p4245_p8), [#allocation5], 4294965248  ;;  %p270_p9 = scmp.lt.s32.totalorder %s3591_s24, 1  ;;  %v3547_v0 = vmov 0.0   ;;  %v281_v1 = vld [vmem:[%s4229_s1 + $0x8] sm:$0xff]  ;;  %v280_v2 = vld [vmem:[%s4229_s1] sm:$0xff] }
  0x47   : > { %374 = vmatprep.mubr.f32.mxu1 %v3547_v0  ;;  %597 = vmatprep.mubr.f32.mxu0 %v3547_v0  ;;  %vm306_vm0 = vcmask 64512   ;;  %v453_v4 = vld [vmem:[#allocation2 + $0x8] sm:$0xff]  ;;  %v283_v6 = vld [vmem:[%s4229_s1 + $0x18] sm:$0xff]  ;;  %v452_v8 = vld [vmem:[#allocation2] sm:$0xff]  ;;  %vm3549_vm1 = vmmov 0  }
  0x48   : > { %s4248_s24 = smov (!%p270_p9, %s3591_s24), 1  ;;  %310 = vmatprep.subr.mxu1 %v281_v1  ;;  %v457_v5 = vld [vmem:[#allocation2 + $0x28] sm:$0xff]  ;;  %v456_v9 = vld [vmem:[#allocation2 + $0x20] sm:$0xff]  ;;  %v282_v10 = vld [vmem:[%s4229_s1 + $0x10] sm:$0xff] }
  0x49   : > { %s2312_s25 = sshll.u32 %s4248_s24, 3  ;;  %311 = vmatpush1.msra.mxu1 %v280_v2  ;;  %v3686_v7 = vpack.c.bf16 %v457_v5, %v453_v4  ;;  %v3692_v11 = vpack.c.bf16 %v456_v9, %v452_v8  ;;  %v455_v12 = vld [vmem:[#allocation2 + $0x18] sm:$0xff]  ;;  %v461_v14 = vld [vmem:[#allocation2 + $0x48] sm:$0xff]  ;;  %v454_v17 = vld [vmem:[#allocation2 + $0x10] sm:$0xff]  ;;  %s3320_s22 = smul.u32 56, %s4248_s24 }
  0x4a   : > { %s273_s10 = scalar_lea.vmem %s4228_s0, %s2312_s25  ;;  %381 = vmatprep.subr.mxu1 %v283_v6  ;;  %v459_v13 = vld [vmem:[#allocation2 + $0x38] sm:$0xff]  ;;  %v465_v16 = vld [vmem:[#allocation2 + $0x68] sm:$0xff]  ;;  %v458_v18 = vld [vmem:[#allocation2 + $0x30] sm:$0xff] }
  0x4b   : > { %v279_v3 = vld [vmem:[%s273_s10] sm:$0xff]  ;;  %2705 = vmatprep.subr.bf16.mxu0 %v3686_v7  ;;  %v3695_v15 = vpack.c.bf16 %v459_v13, %v455_v12  ;;  %v3699_v19 = vpack.c.bf16 %v465_v16, %v461_v14  ;;  %v3701_v20 = vpack.c.bf16 %v458_v18, %v454_v17  ;;  %v463_v23 = vld [vmem:[#allocation2 + $0x58] sm:$0xff]  ;;  %v469_v26 = vld [vmem:[#allocation2 + $0x88] sm:$0xff]  ;;  %s3923_s7 = scalar_lea.vmem %s4234_s6, %s3320_s22 }
  0x4c   : > { %2314 = vmatmul.mubr.msk.f32.vlgmr.msra.gmra.mrb[0].mxu1 %vm306_vm0, %v279_v3  ;;  %2707 = vmatpush1.bf16.msra.mxu0 %v3692_v11  ;;  %v460_v21 = vld [vmem:[#allocation2 + $0x40] sm:$0xff]  ;;  %v467_v25 = vld [vmem:[#allocation2 + $0x78] sm:$0xff]  ;;  %v473_v27 = vld [vmem:[#allocation2 + $0xa8] sm:$0xff] }
  0x4d   : > { %382 = vmatpush1.msra.mxu1 %v282_v10  ;;  %445 = vmatprep.mubr.f32.mxu1 %v3547_v0  ;;  %v464_v22 = vld [vmem:[#allocation2 + $0x60] sm:$0xff]  ;;  %v3708_v28 = vpack.c.bf16 %v467_v25, %v463_v23  ;;  %v3710_v29 = vpack.c.bf16 %v473_v27, %v469_v26  ;;  %v462_v30 = vld [vmem:[#allocation2 + $0x50] sm:$0xff]  ;;  %v471_v35 = vld [vmem:[#allocation2 + $0x98] sm:$0xff] }
  0x4e   : > { %2737 = vmatprep.subr.bf16.mxu1 %v3695_v15  ;;  %v3704_v24 = vpack.c.bf16 %v464_v22, %v460_v21  ;;  %2709 = vmatprep.subr.bf16.mxu0 %v3699_v19  ;;  %v466_v31 = vld [vmem:[#allocation2 + $0x70] sm:$0xff]  ;;  %v468_v32 = vld [vmem:[#allocation2 + $0x80] sm:$0xff]  ;;  %v475_v36 = vld [vmem:[#allocation2 + $0xb8] sm:$0xff] }
  0x4f   : > { %v3713_v33 = vpack.c.bf16 %v466_v31, %v462_v30  ;;  %v472_v34 = vld [vmem:[#allocation2 + $0xa0] sm:$0xff]  ;;  %v3720_v38 = vpack.c.bf16 %v475_v36, %v471_v35  ;;  %v477_v39 = vld [vmem:[#allocation2 + $0xc8] sm:$0xff]  ;;  %v470_v41 = vld [vmem:[#allocation2 + $0x90] sm:$0xff] }
  0x50   : > { %2315 = vmatmul.mubr.msk.f32.vlgmr.msra.gmra.mrb[2].mxu1 %vm306_vm0, %v279_v3  ;;  %2711 = vmatpush1.bf16.msra.mxu0 %v3704_v24  ;;  %v3718_v37 = vpack.c.bf16 %v472_v34, %v468_v32  ;;  %v481_v40 = vld [vmem:[#allocation2 + $0xe8] sm:$0xff]  ;;  %v474_v43 = vld [vmem:[#allocation2 + $0xb0] sm:$0xff]  ;;  %v476_v44 = vld [vmem:[#allocation2 + $0xc0] sm:$0xff] }
  0x51   : > { %2739 = vmatpush1.bf16.msra.mxu1 %v3701_v20  ;;  %668 = vmatprep.mubr.f32.mxu1 %v3547_v0  ;;  %v3723_v42 = vpack.c.bf16 %v481_v40, %v477_v39  ;;  %v480_v45 = vld [vmem:[#allocation2 + $0xe0] sm:$0xff]  ;;  %v479_v46 = vld [vmem:[#allocation2 + $0xd8] sm:$0xff]  ;;  %v485_v48 = vld [vmem:[#allocation2 + $0x108] sm:$0xff]  ;;  %v3726_v49 = vpack.c.bf16 %v474_v43, %v470_v41 }
  0x52   : > { %2741 = vmatprep.subr.bf16.mxu1 %v3708_v28  ;;  %2713 = vmatprep.subr.bf16.mxu0 %v3710_v29  ;;  %v483_v47 = vld [vmem:[#allocation2 + $0xf8] sm:$0xff]  ;;  %v489_v50 = vld [vmem:[#allocation2 + $0x128] sm:$0xff]  ;;  %v3730_v51 = vpack.c.bf16 %v480_v45, %v476_v44  ;;  %v478_v53 = vld [vmem:[#allocation2 + $0xd0] sm:$0xff] }
  0x53   : > { %v3732_v52 = vpack.c.bf16 %v483_v47, %v479_v46  ;;  %v482_v54 = vld [vmem:[#allocation2 + $0xf0] sm:$0xff]  ;;  %v484_v55 = vld [vmem:[#allocation2 + $0x100] sm:$0xff]  ;;  %v3735_v56 = vpack.c.bf16 %v489_v50, %v485_v48  ;;  %v487_v58 = vld [vmem:[#allocation2 + $0x118] sm:$0xff] }
  0x54   : > { %2715 = vmatpush1.bf16.msra.mxu0 %v3718_v37  ;;  %v488_v57 = vld [vmem:[#allocation2 + $0x120] sm:$0xff]  ;;  %v491_v59 = vld [vmem:[#allocation2 + $0x138] sm:$0xff]  ;;  %v493_v60 = vld [vmem:[#allocation2 + $0x148] sm:$0xff]  ;;  %v3738_v62 = vpack.c.bf16 %v482_v54, %v478_v53 }
  0x55   : > { %2743 = vmatpush1.bf16.msra.mxu1 %v3713_v33  ;;  %2717 = vmatprep.subr.bf16.mxu0 %v3723_v42  ;;  %v497_v61 = vld [vmem:[#allocation2 + $0x168] sm:$0xff]  ;;  %v3742_v63 = vpack.c.bf16 %v488_v57, %v484_v55  ;;  %v3744_v1 = vpack.c.bf16 %v491_v59, %v487_v58  ;;  %v486_v2 = vld [vmem:[#allocation2 + $0x110] sm:$0xff]  ;;  %v492_v4 = vld [vmem:[#allocation2 + $0x140] sm:$0xff]  ;;  %v4237_v58 = vmov 0.0|0.0  }
  0x56   : > { %2745 = vmatprep.subr.bf16.mxu1 %v3720_v38  ;;  %v490_v3 = vld [vmem:[#allocation2 + $0x130] sm:$0xff]  ;;  %v3747_v5 = vpack.c.bf16 %v497_v61, %v493_v60  ;;  %v496_v6 = vld [vmem:[#allocation2 + $0x160] sm:$0xff]  ;;  %v495_v8 = vld [vmem:[#allocation2 + $0x158] sm:$0xff] }
  0x57   : > { %v499_v9 = vld [vmem:[#allocation2 + $0x178] sm:$0xff]  ;;  %v501_v10 = vld [vmem:[#allocation2 + $0x188] sm:$0xff]  ;;  %v3750_v13 = vpack.c.bf16 %v490_v3, %v486_v2  ;;  %v3754_v14 = vpack.c.bf16 %v496_v6, %v492_v4  ;;  %v494_v17 = vld [vmem:[#allocation2 + $0x150] sm:$0xff] }
  0x58   : > { %2719 = vmatpush1.bf16.msra.mxu0 %v3730_v51  ;;  %v505_v12 = vld [vmem:[#allocation2 + $0x1a8] sm:$0xff]  ;;  %v3756_v16 = vpack.c.bf16 %v499_v9, %v495_v8  ;;  %v498_v18 = vld [vmem:[#allocation2 + $0x170] sm:$0xff]  ;;  %v500_v21 = vld [vmem:[#allocation2 + $0x180] sm:$0xff] }
  0x59   : > { %2747 = vmatpush1.bf16.msra.mxu1 %v3726_v49  ;;  %2721 = vmatprep.subr.bf16.mxu0 %v3735_v56  ;;  %v3759_v22 = vpack.c.bf16 %v505_v12, %v501_v10  ;;  %v504_v23 = vld [vmem:[#allocation2 + $0x1a0] sm:$0xff]  ;;  %v503_v25 = vld [vmem:[#allocation2 + $0x198] sm:$0xff]  ;;  %v509_v27 = vld [vmem:[#allocation2 + $0x1c8] sm:$0xff]  ;;  %v3762_v31 = vpack.c.bf16 %v498_v18, %v494_v17 }
  0x5a   : > { %2749 = vmatprep.subr.bf16.mxu1 %v3732_v52  ;;  %v507_v26 = vld [vmem:[#allocation2 + $0x1b8] sm:$0xff]  ;;  %v513_v30 = vld [vmem:[#allocation2 + $0x1e8] sm:$0xff]  ;;  %v3766_v32 = vpack.c.bf16 %v504_v23, %v500_v21  ;;  %v502_v35 = vld [vmem:[#allocation2 + $0x190] sm:$0xff] }
  0x5b   : > { %v3768_v34 = vpack.c.bf16 %v507_v26, %v503_v25  ;;  %v506_v36 = vld [vmem:[#allocation2 + $0x1b0] sm:$0xff]  ;;  %v508_v39 = vld [vmem:[#allocation2 + $0x1c0] sm:$0xff]  ;;  %v3771_v40 = vpack.c.bf16 %v513_v30, %v509_v27  ;;  %v511_v43 = vld [vmem:[#allocation2 + $0x1d8] sm:$0xff] }
  0x5c   : > { %2723 = vmatpush1.bf16.msra.mxu0 %v3742_v63  ;;  %v512_v41 = vld [vmem:[#allocation2 + $0x1e0] sm:$0xff]  ;;  %v515_v44 = vld [vmem:[#allocation2 + $0x1f8] sm:$0xff]  ;;  %v3774_v45 = vpack.c.bf16 %v506_v36, %v502_v35  ;;  %v510_v48 = vld [vmem:[#allocation2 + $0x1d0] sm:$0xff] }
  0x5d   : > { %2751 = vmatpush1.bf16.msra.mxu1 %v3738_v62  ;;  %2725 = vmatprep.subr.bf16.mxu0 %v3747_v5  ;;  %v3778_v46 = vpack.c.bf16 %v512_v41, %v508_v39  ;;  %v3780_v47 = vpack.c.bf16 %v515_v44, %v511_v43  ;;  %v514_v50 = vld [vmem:[#allocation2 + $0x1f0] sm:$0xff]  ;;  %v516_v54 = vld [vmem:[#allocation4] sm:$0xff]  ;;  %v517_v55 = vld [vmem:[#allocation4 + $0x8] sm:$0xff] }
  0x5e   : > { %2753 = vmatprep.subr.bf16.mxu1 %v3744_v1  ;;  %v3784_v53 = vpack.c.bf16 %v514_v50, %v510_v48  ;;  %v3808_v57 = vpack.c.bf16 %v517_v55, %v516_v54  ;;  %v518_v59 = vld [vmem:[#allocation4 + $0x10] sm:$0xff]  ;;  %v519_v60 = vld [vmem:[#allocation4 + $0x18] sm:$0xff]  ;;  %v520_v2 = vld [vmem:[#allocation4 + $0x20] sm:$0xff]  ;;  %v286_v48 = vlaneseq }
  0x5f   : > { %v3814_v61 = vpack.c.bf16 %v519_v60, %v518_v59  ;;  %v521_v3 = vld [vmem:[#allocation4 + $0x28] sm:$0xff]  ;;  %v522_v6 = vld [vmem:[#allocation4 + $0x30] sm:$0xff]  ;;  %v523_v8 = vld [vmem:[#allocation4 + $0x38] sm:$0xff] }
  0x60   : > { %2727 = vmatpush1.bf16.msra.mxu0 %v3754_v14  ;;  %v3818_v4 = vpack.c.bf16 %v521_v3, %v520_v2  ;;  %v3822_v9 = vpack.c.bf16 %v523_v8, %v522_v6  ;;  %v524_v10 = vld [vmem:[#allocation4 + $0x40] sm:$0xff]  ;;  %v525_v12 = vld [vmem:[#allocation4 + $0x48] sm:$0xff]  ;;  %v526_v18 = vld [vmem:[#allocation4 + $0x50] sm:$0xff]  ;;  %v287_v50 = vshrl.u32 %v286_v48, 7 }
  0x61   : > { %2755 = vmatpush1.bf16.msra.mxu1 %v3750_v13  ;;  %2729 = vmatprep.subr.bf16.mxu0 %v3759_v22  ;;  %v3826_v17 = vpack.c.bf16 %v525_v12, %v524_v10  ;;  %v527_v21 = vld [vmem:[#allocation4 + $0x58] sm:$0xff]  ;;  %v528_v25 = vld [vmem:[#allocation4 + $0x60] sm:$0xff]  ;;  %v529_v26 = vld [vmem:[#allocation4 + $0x68] sm:$0xff] }
  0x62   : > { %2757 = vmatprep.subr.bf16.mxu1 %v3756_v16  ;;  %v3830_v23 = vpack.c.bf16 %v527_v21, %v526_v18  ;;  %v3835_v27 = vpack.c.bf16 %v529_v26, %v528_v25  ;;  %v530_v30 = vld [vmem:[#allocation4 + $0x70] sm:$0xff]  ;;  %v531_v35 = vld [vmem:[#allocation4 + $0x78] sm:$0xff]  ;;  %v288_v54 = vsub.s32 0, %v287_v50  ;;  %v284_v55 = vld [vmem:[%s4231_s3] sm:$0xf]  ;;  %v292_v59 = vsub.s32 1, %v287_v50 }
  0x63   : > { %v3839_v36 = vpack.c.bf16 %v531_v35, %v530_v30  ;;  %v300_v3 = vsub.s32 3, %v287_v50  ;;  %v296_v26 = vsub.s32 2, %v287_v50 }
  0x64   : > { %2731 = vmatpush1.bf16.msra.mxu0 %v3766_v32  ;;  %v289_v60 = vrot.slane %v284_v55, %v288_v54  ;;  %v293_v2 = vrot.slane %v284_v55, %v292_v59 }
  0x65   : > { %2759 = vmatpush1.bf16.msra.mxu1 %v3762_v31  ;;  %2733 = vmatprep.subr.bf16.mxu0 %v3771_v40  ;;  %v301_v21 = vrot.slane %v284_v55, %v300_v3 }
  0x66   : > { %2761 = vmatprep.subr.bf16.mxu1 %v3768_v34 }
  0x68   : > { %2735 = vmatpush1.bf16.msra.mxu0 %v3778_v46 }
  0x69   : > { %2763 = vmatpush1.bf16.msra.mxu1 %v3774_v45  ;;  %2768 = vmatprep.subr.bf16.mxu0 %v4237_v58 }
  0x6a   : > { %2765 = vmatprep.subr.bf16.mxu1 %v3780_v47 }
  0x6b   : > { %598 = vmatmul.mubr.f32.vlgmr.msra.gmra.mrb[0].mxu0 %v3547_v0 }
  0x6c   : > { %2770 = vmatpush3.bf16.msra.mxu0 %v3808_v57  ;;  %2491 = vmatprep.mubr.msk.f32.mxu0 %vm3549_vm1, %v3547_v0 }
  0x6d   : > { %2767 = vmatpush1.bf16.msra.mxu1 %v3784_v53  ;;  %2771 = vmatprep.subr.bf16.mxu0 %v4237_v58 }
  0x6e   : > { %2793 = vmatprep.subr.bf16.mxu1 %v3686_v7 }
  0x70   : > { %669 = vmatmul.mubr.f32.vlgmr.msra.gmra.mrb[4].mxu1 %v3547_v0  ;;  %2773 = vmatpush3.bf16.msra.mxu0 %v3814_v61 }
  0x71   : > { %2795 = vmatpush1.bf16.msra.mxu1 %v3692_v11  ;;  %844 = vmatprep.mubr.f32.mxu1 %v3547_v0 }
  0x72   : > { %2797 = vmatprep.subr.bf16.mxu1 %v3699_v19  ;;  %2774 = vmatprep.subr.bf16.mxu0 %v4237_v58 }
  0x74   : > { %2776 = vmatpush3.bf16.msra.mxu0 %v3818_v4 }
  0x75   : > { %2799 = vmatpush1.bf16.msra.mxu1 %v3704_v24  ;;  %2777 = vmatprep.subr.bf16.mxu0 %v4237_v58 }
  0x76   : > { %2801 = vmatprep.subr.bf16.mxu1 %v3710_v29 }
  0x78   : > { %2779 = vmatpush3.bf16.msra.mxu0 %v3822_v9 }
  0x79   : > { %2803 = vmatpush1.bf16.msra.mxu1 %v3718_v37  ;;  %2780 = vmatprep.subr.bf16.mxu0 %v4237_v58 }
  0x7a   : > { %2805 = vmatprep.subr.bf16.mxu1 %v3723_v42 }
  0x7c   : > { %2782 = vmatpush3.bf16.msra.mxu0 %v3826_v17 }
  0x7d   : > { %2807 = vmatpush1.bf16.msra.mxu1 %v3730_v51  ;;  %2783 = vmatprep.subr.bf16.mxu0 %v4237_v58 }
  0x7e   : > { %2809 = vmatprep.subr.bf16.mxu1 %v3735_v56 }
  0x80   : > { %2785 = vmatpush3.bf16.msra.mxu0 %v3830_v23 }
  0x81   : > { %2811 = vmatpush1.bf16.msra.mxu1 %v3742_v63  ;;  %2786 = vmatprep.subr.bf16.mxu0 %v4237_v58 }
  0x82   : > { %2813 = vmatprep.subr.bf16.mxu1 %v3747_v5 }
  0x84   : > { %2788 = vmatpush3.bf16.msra.mxu0 %v3835_v27 }
  0x85   : > { %2815 = vmatpush1.bf16.msra.mxu1 %v3754_v14  ;;  %2789 = vmatprep.subr.bf16.mxu0 %v4237_v58 }
  0x86   : > { %2817 = vmatprep.subr.bf16.mxu1 %v3759_v22 }
  0x88   : > { %2791 = vmatpush3.bf16.msra.mxu0 %v3839_v36 }
  0x89   : > { %2819 = vmatpush1.bf16.msra.mxu1 %v3766_v32  ;;  %2825 = vmatprep.subr.bf16.mxu0 %v3695_v15 }
  0x8a   : > { %2821 = vmatprep.subr.bf16.mxu1 %v3771_v40 }
  0x8d   : > { %2823 = vmatpush1.bf16.msra.mxu1 %v3778_v46 }
  0x8e   : > { %2856 = vmatprep.subr.bf16.mxu1 %v4237_v58 }
 0x11f   : > { %v376_v39 = vpop.f32.mrb[0].mxu1 }
 0x120   : > { %v378_v41 = vpop.f32.mrb[1].mxu1  ;;  %v3847_v6 = vadd.f32 %v376_v39, %v289_v60  ;;  %v297_v39 = vrot.slane %v284_v55, %v296_v26 }
 0x121   : > { %v3849_v8 = vadd.f32 %v378_v41, %v293_v2 }
 0x123   : > { %v447_v43 = vpop.f32.mrb[2].mxu1 }
 0x124   : > { %v449_v44 = vpop.f32.mrb[3].mxu1  ;;  %v3856_v59 = vadd.f32 %v447_v43, %v297_v39  ;;  %v4246_v39 = vmov 0.0|0.0  }
 0x125   : > { %v3853_v54 = vadd.f32 %v449_v44, %v301_v21 }
 0x13e   : > { %v599_v10 = vpop.f32.mrb[0].mxu0 }
 0x13f   : > { %v675_v12 = vadd.f32 %v599_v10, %v3847_v6  ;;  %v601_v18 = vpop.f32.mrb[1].mxu0 }
 0x140   : > { %v676_v25 = vadd.f32 %v601_v18, %v3849_v8 }
 0x141   : > { %v2316_v30 = vmul.f32 -1.442695, %v675_v12 }
 0x142   : > { %v2317_v48 = vmul.f32 -1.442695, %v676_v25 }
 0x143   : > { %v670_v35 = vpop.f32.mrb[4].mxu1  ;;  %3357 = vpow2.f32 %v2316_v30 }
 0x144   : > { %v672_v58 = vpop.f32.mrb[5].mxu1  ;;  %3359 = vpow2.f32 %v2317_v48  ;;  %v677_v2 = vadd.f32 %v670_v35, %v3856_v59 }
 0x145   : > { %v678_v41 = vadd.f32 %v672_v58, %v3853_v54 }
 0x147   : > { %v2318_v60 = vmul.f32 -1.442695, %v678_v41  ;;  %v3918_v41 = vld [vmem:[%s4233_s5] ss:$0 sm:$0xff] }
 0x149   : > { %3361 = vpow2.f32 %v2318_v60 }
 0x14a   : > { %3363 = vtanh.f32 %v677_v2 }
 0x14d   : > { %v3358_v3 = vpop.eup %3357 }
 0x14e   : > { %v3360_v10 = vpop.eup %3359  ;;  %v682_v18 = vadd.f32 1.0, %v3358_v3 }
 0x14f   : > { %v688_v50 = vadd.f32 1.0, %v3360_v10 }
 0x150   : > { %3365 = vrcp.f32 %v682_v18 }
 0x151   : > { %3367 = vrcp.f32 %v688_v50 }
 0x153   : > { %v3362_v12 = vpop.eup %3361 }
 0x154   : > { %v3364_v44 = vpop.eup %3363  ;;  %v695_v26 = vadd.f32 1.0, %v3362_v12 }
 0x156   : > { %3369 = vrcp.f32 %v695_v26 }
 0x15a   : > { %v3366_v21 = vpop.eup %3365 }
 0x15b   : > { %v3368_v25 = vpop.eup %3367  ;;  %v699_v55 = vmul.f32 %v3366_v21, %v3364_v44 }
 0x15c   : > { %v698_v58 = vmul.f32 0.0, %v3368_v25 }
 0x15e   : > { %v3859_v43 = vadd.f32 %v699_v55, %v698_v58 }
 0x160   : > { %3371 = vtanh.f32 %v3859_v43  ;;  %v3370_v30 = vpop.eup %3369 }
 0x16a   : > { %v3372_v35 = vpop.eup %3371 }
 0x16b   : > { %v702_v48 = vmul.f32 %v3372_v35, %v3370_v30 }
 0x16d   : > { %2492 = vmatmul.mubr.f32.vlgmr.msra.gmra.mrb[2].mxu0 %v702_v48  ;;  %845 = vmatmul.mubr.f32.vlgmr.msra.gmra.mrb[6].mxu1 %v702_v48 }
 0x16e   : > { %2827 = vmatpush1.bf16.msra.mxu0 %v3701_v20  ;;  %915 = vmatprep.mubr.f32.mxu0 %v3547_v0 }
 0x16f   : > { %2829 = vmatprep.subr.bf16.mxu0 %v3708_v28  ;;  %2858 = vmatpush3.bf16.msra.mxu1 %v3808_v57 }
 0x170   : > { %2859 = vmatprep.subr.bf16.mxu1 %v4246_v39  ;;  %2526 = vmatprep.mubr.msk.f32.mxu1 %vm3549_vm1, %v3547_v0 }
 0x172   : > { %2831 = vmatpush1.bf16.msra.mxu0 %v3713_v33 }
 0x173   : > { %2833 = vmatprep.subr.bf16.mxu0 %v3720_v38  ;;  %2861 = vmatpush3.bf16.msra.mxu1 %v3814_v61 }
 0x174   : > { %2862 = vmatprep.subr.bf16.mxu1 %v4246_v39 }
 0x176   : > { %2835 = vmatpush1.bf16.msra.mxu0 %v3726_v49 }
 0x177   : > { %2837 = vmatprep.subr.bf16.mxu0 %v3732_v52  ;;  %2864 = vmatpush3.bf16.msra.mxu1 %v3818_v4 }
 0x178   : > { %2865 = vmatprep.subr.bf16.mxu1 %v4246_v39 }
 0x17a   : > { %2839 = vmatpush1.bf16.msra.mxu0 %v3738_v62 }
 0x17b   : > { %2841 = vmatprep.subr.bf16.mxu0 %v3744_v1  ;;  %2867 = vmatpush3.bf16.msra.mxu1 %v3822_v9 }
 0x17c   : > { %2868 = vmatprep.subr.bf16.mxu1 %v4246_v39 }
 0x17e   : > { %2843 = vmatpush1.bf16.msra.mxu0 %v3750_v13 }
 0x17f   : > { %2845 = vmatprep.subr.bf16.mxu0 %v3756_v16  ;;  %2870 = vmatpush3.bf16.msra.mxu1 %v3826_v17 }
 0x180   : > { %2871 = vmatprep.subr.bf16.mxu1 %v4246_v39 }
 0x182   : > { %2847 = vmatpush1.bf16.msra.mxu0 %v3762_v31 }
 0x183   : > { %2849 = vmatprep.subr.bf16.mxu0 %v3768_v34  ;;  %2873 = vmatpush3.bf16.msra.mxu1 %v3830_v23 }
 0x184   : > { %2874 = vmatprep.subr.bf16.mxu1 %v4246_v39 }
 0x186   : > { %2851 = vmatpush1.bf16.msra.mxu0 %v3774_v45 }
 0x187   : > { %2853 = vmatprep.subr.bf16.mxu0 %v3780_v47  ;;  %2876 = vmatpush3.bf16.msra.mxu1 %v3835_v27 }
 0x188   : > { %2877 = vmatprep.subr.bf16.mxu1 %v4246_v39 }
 0x18a   : > { %2855 = vmatpush1.bf16.msra.mxu0 %v3784_v53 }
 0x18b   : > { %2881 = vmatprep.subr.bf16.mxu0 %v3686_v7  ;;  %2879 = vmatpush3.bf16.msra.mxu1 %v3839_v36 }
 0x18c   : > { %2913 = vmatprep.subr.bf16.mxu1 %v3695_v15 }
 0x18d   : > { %916 = vmatmul.mubr.f32.vlgmr.msra.gmra.mrb[4].mxu0 %v702_v48 }
 0x18e   : > { %2883 = vmatpush1.bf16.msra.mxu0 %v3692_v11  ;;  %1085 = vmatprep.mubr.f32.mxu0 %v3547_v0 }
 0x18f   : > { %2885 = vmatprep.subr.bf16.mxu0 %v3699_v19 }
 0x192   : > { %2887 = vmatpush1.bf16.msra.mxu0 %v3704_v24 }
 0x193   : > { %2889 = vmatprep.subr.bf16.mxu0 %v3710_v29 }
 0x196   : > { %2891 = vmatpush1.bf16.msra.mxu0 %v3718_v37 }
 0x197   : > { %2893 = vmatprep.subr.bf16.mxu0 %v3723_v42 }
 0x19a   : > { %2895 = vmatpush1.bf16.msra.mxu0 %v3730_v51 }
 0x19b   : > { %2897 = vmatprep.subr.bf16.mxu0 %v3735_v56 }
 0x19e   : > { %2899 = vmatpush1.bf16.msra.mxu0 %v3742_v63 }
 0x19f   : > { %2901 = vmatprep.subr.bf16.mxu0 %v3747_v5 }
 0x1a2   : > { %2903 = vmatpush1.bf16.msra.mxu0 %v3754_v14 }
 0x1a3   : > { %2905 = vmatprep.subr.bf16.mxu0 %v3759_v22 }
 0x1a6   : > { %2907 = vmatpush1.bf16.msra.mxu0 %v3766_v32 }
 0x1a7   : > { %2909 = vmatprep.subr.bf16.mxu0 %v3771_v40 }
 0x1aa   : > { %2911 = vmatpush1.bf16.msra.mxu0 %v3778_v46 }
 0x1ab   : > { %2944 = vmatprep.subr.bf16.mxu0 %v4246_v39 }
 0x240   : > { %v775_v60 = vpop.f32.mrb[2].mxu0  ;;  %v846_v2 = vpop.f32.mrb[6].mxu1 }
 0x241   : > { %v776_v3 = vadd.f32 %v3918_v41, %v775_v60  ;;  %v2493_v10 = vpop.f32.mrb[3].mxu0  ;;  %v848_v18 = vpop.f32.mrb[7].mxu1  ;;  %v922_v12 = vadd.f32 %v846_v2, %v3847_v6 }
 0x242   : > { %v923_v50 = vadd.f32 %v848_v18, %v3849_v8 }
 0x243   : > { %779 = vst [vmem:[%s3923_s7] sm:$0xff] %v776_v3  ;;  %v2320_v21 = vmul.f32 -1.442695, %v922_v12 }
 0x244   : > { %v2321_v44 = vmul.f32 -1.442695, %v923_v50 }
 0x246   : > { %3373 = vpow2.f32 %v2321_v44 }
 0x247   : > { %3375 = vpow2.f32 %v2320_v21 }
 0x250   : > { %v3374_v25 = vpop.eup %3373 }
 0x251   : > { %v3376_v55 = vpop.eup %3375  ;;  %v935_v26 = vadd.f32 1.0, %v3374_v25 }
 0x252   : > { %v929_v58 = vadd.f32 1.0, %v3376_v55 }
 0x253   : > { %3377 = vrcp.f32 %v935_v26 }
 0x254   : > { %3379 = vrcp.f32 %v929_v58 }
 0x25d   : > { %v3378_v2 = vpop.eup %3377 }
 0x25e   : > { %v3380_v10 = vpop.eup %3379  ;;  %v945_v50 = vmul.f32 %v3378_v2, %v3859_v43 }
 0x260   : > { %v917_v30 = vpop.f32.mrb[4].mxu0 }
 0x261   : > { %v924_v35 = vadd.f32 %v917_v30, %v3856_v59  ;;  %v919_v48 = vpop.f32.mrb[5].mxu0 }
 0x262   : > { %v925_v60 = vadd.f32 %v919_v48, %v3853_v54 }
 0x263   : > { %3381 = vtanh.f32 %v924_v35 }
 0x264   : > { %v2322_v3 = vmul.f32 -1.442695, %v925_v60 }
 0x266   : > { %3383 = vpow2.f32 %v2322_v3 }
 0x26d   : > { %v3382_v18 = vpop.eup %3381 }
 0x26e   : > { %v946_v12 = vmul.f32 %v3382_v18, %v3380_v10 }
 0x270   : > { %v3384_v44 = vpop.eup %3383  ;;  %v3932_v21 = vadd.f32 %v946_v12, %v945_v50 }
 0x271   : > { %v942_v25 = vadd.f32 1.0, %v3384_v44 }
 0x272   : > { %3385 = vtanh.f32 %v3932_v21 }
 0x273   : > { %3387 = vrcp.f32 %v942_v25 }
 0x27c   : > { %v3386_v55 = vpop.eup %3385 }
 0x27d   : > { %v3388_v26 = vpop.eup %3387 }
 0x27e   : > { %v949_v58 = vmul.f32 %v3388_v26, %v3386_v55 }
 0x280   : > { %2527 = vmatmul.mubr.f32.vlgmr.msra.gmra.mrb[8].mxu1 %v949_v58  ;;  %1086 = vmatmul.mubr.f32.vlgmr.msra.gmra.mrb[6].mxu0 %v949_v58 }
 0x281   : > { %2915 = vmatpush1.bf16.msra.mxu1 %v3701_v20  ;;  %1156 = vmatprep.mubr.f32.mxu1 %v3547_v0 }
 0x282   : > { %2917 = vmatprep.subr.bf16.mxu1 %v3708_v28  ;;  %2946 = vmatpush3.bf16.msra.mxu0 %v3808_v57 }
 0x283   : > { %2947 = vmatprep.subr.bf16.mxu0 %v4246_v39  ;;  %2561 = vmatprep.mubr.msk.f32.mxu0 %vm3549_vm1, %v3547_v0 }
 0x285   : > { %2919 = vmatpush1.bf16.msra.mxu1 %v3713_v33 }
 0x286   : > { %2921 = vmatprep.subr.bf16.mxu1 %v3720_v38  ;;  %2949 = vmatpush3.bf16.msra.mxu0 %v3814_v61 }
 0x287   : > { %2950 = vmatprep.subr.bf16.mxu0 %v4246_v39 }
 0x289   : > { %2923 = vmatpush1.bf16.msra.mxu1 %v3726_v49 }
 0x28a   : > { %2925 = vmatprep.subr.bf16.mxu1 %v3732_v52  ;;  %2952 = vmatpush3.bf16.msra.mxu0 %v3818_v4 }
 0x28b   : > { %2953 = vmatprep.subr.bf16.mxu0 %v4246_v39 }
 0x28d   : > { %2927 = vmatpush1.bf16.msra.mxu1 %v3738_v62 }
 0x28e   : > { %2929 = vmatprep.subr.bf16.mxu1 %v3744_v1  ;;  %2955 = vmatpush3.bf16.msra.mxu0 %v3822_v9 }
 0x28f   : > { %2956 = vmatprep.subr.bf16.mxu0 %v4246_v39 }
 0x291   : > { %2931 = vmatpush1.bf16.msra.mxu1 %v3750_v13 }
 0x292   : > { %2933 = vmatprep.subr.bf16.mxu1 %v3756_v16  ;;  %2958 = vmatpush3.bf16.msra.mxu0 %v3826_v17 }
 0x293   : > { %2959 = vmatprep.subr.bf16.mxu0 %v4246_v39 }
 0x295   : > { %2935 = vmatpush1.bf16.msra.mxu1 %v3762_v31 }
 0x296   : > { %2937 = vmatprep.subr.bf16.mxu1 %v3768_v34  ;;  %2961 = vmatpush3.bf16.msra.mxu0 %v3830_v23 }
 0x297   : > { %2962 = vmatprep.subr.bf16.mxu0 %v4246_v39 }
 0x299   : > { %2939 = vmatpush1.bf16.msra.mxu1 %v3774_v45 }
 0x29a   : > { %2941 = vmatprep.subr.bf16.mxu1 %v3780_v47  ;;  %2964 = vmatpush3.bf16.msra.mxu0 %v3835_v27 }
 0x29b   : > { %2965 = vmatprep.subr.bf16.mxu0 %v4246_v39 }
 0x29d   : > { %2943 = vmatpush1.bf16.msra.mxu1 %v3784_v53 }
 0x29e   : > { %2969 = vmatprep.subr.bf16.mxu1 %v3686_v7  ;;  %2967 = vmatpush3.bf16.msra.mxu0 %v3839_v36 }
 0x29f   : > { %3001 = vmatprep.subr.bf16.mxu0 %v3695_v15 }
 0x2a0   : > { %1157 = vmatmul.mubr.f32.vlgmr.msra.gmra.mrb[10].mxu1 %v949_v58 }
 0x2a1   : > { %2971 = vmatpush1.bf16.msra.mxu1 %v3692_v11  ;;  %1326 = vmatprep.mubr.f32.mxu1 %v3547_v0 }
 0x2a2   : > { %2973 = vmatprep.subr.bf16.mxu1 %v3699_v19 }
 0x2a5   : > { %2975 = vmatpush1.bf16.msra.mxu1 %v3704_v24 }
 0x2a6   : > { %2977 = vmatprep.subr.bf16.mxu1 %v3710_v29 }
 0x2a9   : > { %2979 = vmatpush1.bf16.msra.mxu1 %v3718_v37 }
 0x2aa   : > { %2981 = vmatprep.subr.bf16.mxu1 %v3723_v42 }
 0x2ad   : > { %2983 = vmatpush1.bf16.msra.mxu1 %v3730_v51 }
 0x2ae   : > { %2985 = vmatprep.subr.bf16.mxu1 %v3735_v56 }
 0x2b1   : > { %2987 = vmatpush1.bf16.msra.mxu1 %v3742_v63 }
 0x2b2   : > { %2989 = vmatprep.subr.bf16.mxu1 %v3747_v5 }
 0x2b5   : > { %2991 = vmatpush1.bf16.msra.mxu1 %v3754_v14 }
 0x2b6   : > { %2993 = vmatprep.subr.bf16.mxu1 %v3759_v22 }
 0x2b9   : > { %2995 = vmatpush1.bf16.msra.mxu1 %v3766_v32 }
 0x2ba   : > { %2997 = vmatprep.subr.bf16.mxu1 %v3771_v40 }
 0x2bd   : > { %2999 = vmatpush1.bf16.msra.mxu1 %v3778_v46 }
 0x2be   : > { %3032 = vmatprep.subr.bf16.mxu1 %v4246_v39 }
 0x353   : > { %v1016_v43 = vpop.f32.mrb[8].mxu1  ;;  %v1087_v30 = vpop.f32.mrb[6].mxu0 }
 0x354   : > { %v1017_v35 = vadd.f32 %v3918_v41, %v1016_v43  ;;  %v2528_v48 = vpop.f32.mrb[9].mxu1  ;;  %v1089_v60 = vpop.f32.mrb[7].mxu0  ;;  %v1163_v2 = vadd.f32 %v1087_v30, %v3847_v6 }
 0x355   : > { %v1164_v3 = vadd.f32 %v1089_v60, %v3849_v8 }
 0x356   : > { %1020 = vst [vmem:[%s3923_s7 + $0x8] sm:$0xff] %v1017_v35  ;;  %v2323_v18 = vmul.f32 -1.442695, %v1163_v2 }
 0x357   : > { %v2324_v10 = vmul.f32 -1.442695, %v1164_v3 }
 0x359   : > { %3389 = vpow2.f32 %v2324_v10 }
 0x35a   : > { %3391 = vpow2.f32 %v2323_v18 }
 0x363   : > { %v3390_v50 = vpop.eup %3389 }
 0x364   : > { %v3392_v12 = vpop.eup %3391  ;;  %v1176_v44 = vadd.f32 1.0, %v3390_v50 }
 0x365   : > { %v1170_v25 = vadd.f32 1.0, %v3392_v12 }
 0x366   : > { %3393 = vrcp.f32 %v1176_v44 }
 0x367   : > { %3395 = vrcp.f32 %v1170_v25 }
 0x370   : > { %v3394_v30 = vpop.eup %3393 }
 0x371   : > { %v3396_v48 = vpop.eup %3395  ;;  %v1186_v3 = vmul.f32 %v3394_v30, %v3932_v21 }
 0x373   : > { %v1158_v55 = vpop.f32.mrb[10].mxu1 }
 0x374   : > { %v1165_v26 = vadd.f32 %v1158_v55, %v3856_v59  ;;  %v1160_v58 = vpop.f32.mrb[11].mxu1 }
 0x375   : > { %v1166_v43 = vadd.f32 %v1160_v58, %v3853_v54 }
 0x376   : > { %3397 = vtanh.f32 %v1165_v26 }
 0x377   : > { %v2325_v35 = vmul.f32 -1.442695, %v1166_v43 }
 0x379   : > { %3399 = vpow2.f32 %v2325_v35 }
 0x380   : > { %v3398_v60 = vpop.eup %3397 }
 0x381   : > { %v1187_v2 = vmul.f32 %v3398_v60, %v3396_v48 }
 0x383   : > { %v3400_v10 = vpop.eup %3399  ;;  %v3994_v18 = vadd.f32 %v1187_v2, %v1186_v3 }
 0x384   : > { %v1183_v50 = vadd.f32 1.0, %v3400_v10 }
 0x385   : > { %3401 = vtanh.f32 %v3994_v18 }
 0x386   : > { %3403 = vrcp.f32 %v1183_v50 }
 0x38f   : > { %v3402_v12 = vpop.eup %3401 }
 0x390   : > { %v3404_v44 = vpop.eup %3403 }
 0x391   : > { %v1190_v25 = vmul.f32 %v3404_v44, %v3402_v12 }
 0x393   : > { %2562 = vmatmul.mubr.f32.vlgmr.msra.gmra.mrb[8].mxu0 %v1190_v25  ;;  %1327 = vmatmul.mubr.f32.vlgmr.msra.gmra.mrb[12].mxu1 %v1190_v25 }
 0x394   : > { %3003 = vmatpush1.bf16.msra.mxu0 %v3701_v20  ;;  %1397 = vmatprep.mubr.f32.mxu0 %v3547_v0 }
 0x395   : > { %3005 = vmatprep.subr.bf16.mxu0 %v3708_v28  ;;  %3034 = vmatpush3.bf16.msra.mxu1 %v3808_v57 }
 0x396   : > { %3035 = vmatprep.subr.bf16.mxu1 %v4246_v39  ;;  %2596 = vmatprep.mubr.msk.f32.mxu1 %vm3549_vm1, %v3547_v0 }
 0x398   : > { %3007 = vmatpush1.bf16.msra.mxu0 %v3713_v33 }
 0x399   : > { %3009 = vmatprep.subr.bf16.mxu0 %v3720_v38  ;;  %3037 = vmatpush3.bf16.msra.mxu1 %v3814_v61 }
 0x39a   : > { %3038 = vmatprep.subr.bf16.mxu1 %v4246_v39 }
 0x39c   : > { %3011 = vmatpush1.bf16.msra.mxu0 %v3726_v49 }
 0x39d   : > { %3013 = vmatprep.subr.bf16.mxu0 %v3732_v52  ;;  %3040 = vmatpush3.bf16.msra.mxu1 %v3818_v4 }
 0x39e   : > { %3041 = vmatprep.subr.bf16.mxu1 %v4246_v39 }
 0x3a0   : > { %3015 = vmatpush1.bf16.msra.mxu0 %v3738_v62 }
 0x3a1   : > { %3017 = vmatprep.subr.bf16.mxu0 %v3744_v1  ;;  %3043 = vmatpush3.bf16.msra.mxu1 %v3822_v9 }
 0x3a2   : > { %3044 = vmatprep.subr.bf16.mxu1 %v4246_v39 }
 0x3a4   : > { %3019 = vmatpush1.bf16.msra.mxu0 %v3750_v13 }
 0x3a5   : > { %3021 = vmatprep.subr.bf16.mxu0 %v3756_v16  ;;  %3046 = vmatpush3.bf16.msra.mxu1 %v3826_v17 }
 0x3a6   : > { %3047 = vmatprep.subr.bf16.mxu1 %v4246_v39 }
 0x3a8   : > { %3023 = vmatpush1.bf16.msra.mxu0 %v3762_v31 }
 0x3a9   : > { %3025 = vmatprep.subr.bf16.mxu0 %v3768_v34  ;;  %3049 = vmatpush3.bf16.msra.mxu1 %v3830_v23 }
 0x3aa   : > { %3050 = vmatprep.subr.bf16.mxu1 %v4246_v39 }
 0x3ac   : > { %3027 = vmatpush1.bf16.msra.mxu0 %v3774_v45 }
 0x3ad   : > { %3029 = vmatprep.subr.bf16.mxu0 %v3780_v47  ;;  %3052 = vmatpush3.bf16.msra.mxu1 %v3835_v27 }
 0x3ae   : > { %3053 = vmatprep.subr.bf16.mxu1 %v4246_v39 }
 0x3b0   : > { %3031 = vmatpush1.bf16.msra.mxu0 %v3784_v53 }
 0x3b1   : > { %3057 = vmatprep.subr.bf16.mxu0 %v3686_v7  ;;  %3055 = vmatpush3.bf16.msra.mxu1 %v3839_v36 }
 0x3b2   : > { %3089 = vmatprep.subr.bf16.mxu1 %v3695_v15 }
 0x3b3   : > { %1398 = vmatmul.mubr.f32.vlgmr.msra.gmra.mrb[10].mxu0 %v1190_v25 }
 0x3b4   : > { %3059 = vmatpush1.bf16.msra.mxu0 %v3692_v11  ;;  %1567 = vmatprep.mubr.f32.mxu0 %v3547_v0 }
 0x3b5   : > { %3061 = vmatprep.subr.bf16.mxu0 %v3699_v19 }
 0x3b8   : > { %3063 = vmatpush1.bf16.msra.mxu0 %v3704_v24 }
 0x3b9   : > { %3065 = vmatprep.subr.bf16.mxu0 %v3710_v29 }
 0x3bc   : > { %3067 = vmatpush1.bf16.msra.mxu0 %v3718_v37 }
 0x3bd   : > { %3069 = vmatprep.subr.bf16.mxu0 %v3723_v42 }
 0x3c0   : > { %3071 = vmatpush1.bf16.msra.mxu0 %v3730_v51 }
 0x3c1   : > { %3073 = vmatprep.subr.bf16.mxu0 %v3735_v56 }
 0x3c4   : > { %3075 = vmatpush1.bf16.msra.mxu0 %v3742_v63 }
 0x3c5   : > { %3077 = vmatprep.subr.bf16.mxu0 %v3747_v5 }
 0x3c8   : > { %3079 = vmatpush1.bf16.msra.mxu0 %v3754_v14 }
 0x3c9   : > { %3081 = vmatprep.subr.bf16.mxu0 %v3759_v22 }
 0x3cc   : > { %3083 = vmatpush1.bf16.msra.mxu0 %v3766_v32 }
 0x3cd   : > { %3085 = vmatprep.subr.bf16.mxu0 %v3771_v40 }
 0x3d0   : > { %3087 = vmatpush1.bf16.msra.mxu0 %v3778_v46 }
 0x3d1   : > { %3120 = vmatprep.subr.bf16.mxu0 %v4246_v39 }
 0x466   : > { %v1257_v21 = vpop.f32.mrb[8].mxu0  ;;  %v1328_v55 = vpop.f32.mrb[12].mxu1 }
 0x467   : > { %v1258_v26 = vadd.f32 %v3918_v41, %v1257_v21  ;;  %v2563_v58 = vpop.f32.mrb[9].mxu0  ;;  %v1330_v43 = vpop.f32.mrb[13].mxu1  ;;  %v1404_v30 = vadd.f32 %v1328_v55, %v3847_v6 }
 0x468   : > { %v1405_v35 = vadd.f32 %v1330_v43, %v3849_v8 }
 0x469   : > { %1261 = vst [vmem:[%s3923_s7 + $0x10] sm:$0xff] %v1258_v26  ;;  %v2326_v60 = vmul.f32 -1.442695, %v1404_v30 }
 0x46a   : > { %v2327_v48 = vmul.f32 -1.442695, %v1405_v35 }
 0x46c   : > { %3405 = vpow2.f32 %v2327_v48 }
 0x46d   : > { %3407 = vpow2.f32 %v2326_v60 }
 0x476   : > { %v3406_v3 = vpop.eup %3405 }
 0x477   : > { %v3408_v2 = vpop.eup %3407  ;;  %v1417_v10 = vadd.f32 1.0, %v3406_v3 }
 0x478   : > { %v1411_v50 = vadd.f32 1.0, %v3408_v2 }
 0x479   : > { %3409 = vrcp.f32 %v1417_v10 }
 0x47a   : > { %3411 = vrcp.f32 %v1411_v50 }
 0x483   : > { %v3410_v55 = vpop.eup %3409 }
 0x484   : > { %v3412_v58 = vpop.eup %3411  ;;  %v1427_v35 = vmul.f32 %v3410_v55, %v3994_v18 }
 0x486   : > { %v1399_v12 = vpop.f32.mrb[10].mxu0 }
 0x487   : > { %v1406_v44 = vadd.f32 %v1399_v12, %v3856_v59  ;;  %v1401_v25 = vpop.f32.mrb[11].mxu0 }
 0x488   : > { %v1407_v21 = vadd.f32 %v1401_v25, %v3853_v54 }
 0x489   : > { %3413 = vtanh.f32 %v1406_v44 }
 0x48a   : > { %v2328_v26 = vmul.f32 -1.442695, %v1407_v21 }
 0x48c   : > { %3415 = vpow2.f32 %v2328_v26 }
 0x493   : > { %v3414_v43 = vpop.eup %3413 }
 0x494   : > { %v1428_v30 = vmul.f32 %v3414_v43, %v3412_v58 }
 0x496   : > { %v3416_v48 = vpop.eup %3415  ;;  %v4056_v60 = vadd.f32 %v1428_v30, %v1427_v35 }
 0x497   : > { %v1424_v3 = vadd.f32 1.0, %v3416_v48 }
 0x498   : > { %3417 = vtanh.f32 %v4056_v60 }
 0x499   : > { %3419 = vrcp.f32 %v1424_v3 }
 0x4a2   : > { %v3418_v2 = vpop.eup %3417 }
 0x4a3   : > { %v3420_v10 = vpop.eup %3419 }
 0x4a4   : > { %v1431_v50 = vmul.f32 %v3420_v10, %v3418_v2 }
 0x4a6   : > { %2597 = vmatmul.mubr.f32.vlgmr.msra.gmra.mrb[14].mxu1 %v1431_v50  ;;  %1568 = vmatmul.mubr.f32.vlgmr.msra.gmra.mrb[12].mxu0 %v1431_v50 }
 0x4a7   : > { %3091 = vmatpush1.bf16.msra.mxu1 %v3701_v20  ;;  %1638 = vmatprep.mubr.f32.mxu1 %v3547_v0 }
 0x4a8   : > { %3093 = vmatprep.subr.bf16.mxu1 %v3708_v28  ;;  %3122 = vmatpush3.bf16.msra.mxu0 %v3808_v57 }
 0x4a9   : > { %3123 = vmatprep.subr.bf16.mxu0 %v4246_v39  ;;  %2631 = vmatprep.mubr.msk.f32.mxu0 %vm3549_vm1, %v3547_v0 }
 0x4ab   : > { %3095 = vmatpush1.bf16.msra.mxu1 %v3713_v33 }
 0x4ac   : > { %3097 = vmatprep.subr.bf16.mxu1 %v3720_v38  ;;  %3125 = vmatpush3.bf16.msra.mxu0 %v3814_v61 }
 0x4ad   : > { %3126 = vmatprep.subr.bf16.mxu0 %v4246_v39 }
 0x4af   : > { %3099 = vmatpush1.bf16.msra.mxu1 %v3726_v49 }
 0x4b0   : > { %3101 = vmatprep.subr.bf16.mxu1 %v3732_v52  ;;  %3128 = vmatpush3.bf16.msra.mxu0 %v3818_v4 }
 0x4b1   : > { %3129 = vmatprep.subr.bf16.mxu0 %v4246_v39 }
 0x4b3   : > { %3103 = vmatpush1.bf16.msra.mxu1 %v3738_v62 }
 0x4b4   : > { %3105 = vmatprep.subr.bf16.mxu1 %v3744_v1  ;;  %3131 = vmatpush3.bf16.msra.mxu0 %v3822_v9 }
 0x4b5   : > { %3132 = vmatprep.subr.bf16.mxu0 %v4246_v39 }
 0x4b7   : > { %3107 = vmatpush1.bf16.msra.mxu1 %v3750_v13 }
 0x4b8   : > { %3109 = vmatprep.subr.bf16.mxu1 %v3756_v16  ;;  %3134 = vmatpush3.bf16.msra.mxu0 %v3826_v17 }
 0x4b9   : > { %3135 = vmatprep.subr.bf16.mxu0 %v4246_v39 }
 0x4bb   : > { %3111 = vmatpush1.bf16.msra.mxu1 %v3762_v31 }
 0x4bc   : > { %3113 = vmatprep.subr.bf16.mxu1 %v3768_v34  ;;  %3137 = vmatpush3.bf16.msra.mxu0 %v3830_v23 }
 0x4bd   : > { %3138 = vmatprep.subr.bf16.mxu0 %v4246_v39 }
 0x4bf   : > { %3115 = vmatpush1.bf16.msra.mxu1 %v3774_v45 }
 0x4c0   : > { %3117 = vmatprep.subr.bf16.mxu1 %v3780_v47  ;;  %3140 = vmatpush3.bf16.msra.mxu0 %v3835_v27 }
 0x4c1   : > { %3141 = vmatprep.subr.bf16.mxu0 %v4246_v39 }
 0x4c3   : > { %3119 = vmatpush1.bf16.msra.mxu1 %v3784_v53 }
 0x4c4   : > { %3145 = vmatprep.subr.bf16.mxu1 %v3686_v7  ;;  %3143 = vmatpush3.bf16.msra.mxu0 %v3839_v36 }
 0x4c5   : > { %3177 = vmatprep.subr.bf16.mxu0 %v3695_v15 }
 0x4c6   : > { %1639 = vmatmul.mubr.f32.vlgmr.msra.gmra.mrb[16].mxu1 %v1431_v50 }
 0x4c7   : > { %3147 = vmatpush1.bf16.msra.mxu1 %v3692_v11  ;;  %1808 = vmatprep.mubr.f32.mxu1 %v3547_v0 }
 0x4c8   : > { %3149 = vmatprep.subr.bf16.mxu1 %v3699_v19 }
 0x4cb   : > { %3151 = vmatpush1.bf16.msra.mxu1 %v3704_v24 }
 0x4cc   : > { %3153 = vmatprep.subr.bf16.mxu1 %v3710_v29 }
 0x4cf   : > { %3155 = vmatpush1.bf16.msra.mxu1 %v3718_v37 }
 0x4d0   : > { %3157 = vmatprep.subr.bf16.mxu1 %v3723_v42 }
 0x4d3   : > { %3159 = vmatpush1.bf16.msra.mxu1 %v3730_v51 }
 0x4d4   : > { %3161 = vmatprep.subr.bf16.mxu1 %v3735_v56 }
 0x4d7   : > { %3163 = vmatpush1.bf16.msra.mxu1 %v3742_v63 }
 0x4d8   : > { %3165 = vmatprep.subr.bf16.mxu1 %v3747_v5 }
 0x4db   : > { %3167 = vmatpush1.bf16.msra.mxu1 %v3754_v14 }
 0x4dc   : > { %3169 = vmatprep.subr.bf16.mxu1 %v3759_v22 }
 0x4df   : > { %3171 = vmatpush1.bf16.msra.mxu1 %v3766_v32 }
 0x4e0   : > { %3173 = vmatprep.subr.bf16.mxu1 %v3771_v40 }
 0x4e3   : > { %3175 = vmatpush1.bf16.msra.mxu1 %v3778_v46 }
 0x4e4   : > { %3208 = vmatprep.subr.bf16.mxu1 %v4246_v39 }
 0x579   : > { %v1498_v18 = vpop.f32.mrb[14].mxu1  ;;  %v1569_v12 = vpop.f32.mrb[12].mxu0 }
 0x57a   : > { %v1499_v44 = vadd.f32 %v3918_v41, %v1498_v18  ;;  %v2598_v25 = vpop.f32.mrb[15].mxu1  ;;  %v1571_v21 = vpop.f32.mrb[13].mxu0  ;;  %v1645_v55 = vadd.f32 %v1569_v12, %v3847_v6 }
 0x57b   : > { %v1646_v26 = vadd.f32 %v1571_v21, %v3849_v8 }
 0x57c   : > { %1502 = vst [vmem:[%s3923_s7 + $0x18] sm:$0xff] %v1499_v44  ;;  %v2329_v43 = vmul.f32 -1.442695, %v1645_v55 }
 0x57d   : > { %v2330_v58 = vmul.f32 -1.442695, %v1646_v26 }
 0x57f   : > { %3421 = vpow2.f32 %v2330_v58 }
 0x580   : > { %3423 = vpow2.f32 %v2329_v43 }
 0x589   : > { %v3422_v35 = vpop.eup %3421 }
 0x58a   : > { %v3424_v30 = vpop.eup %3423  ;;  %v1658_v48 = vadd.f32 1.0, %v3422_v35 }
 0x58b   : > { %v1652_v3 = vadd.f32 1.0, %v3424_v30 }
 0x58c   : > { %3425 = vrcp.f32 %v1658_v48 }
 0x58d   : > { %3427 = vrcp.f32 %v1652_v3 }
 0x596   : > { %v3426_v12 = vpop.eup %3425 }
 0x597   : > { %v3428_v25 = vpop.eup %3427  ;;  %v1668_v26 = vmul.f32 %v3426_v12, %v4056_v60 }
 0x599   : > { %v1640_v2 = vpop.f32.mrb[16].mxu1 }
 0x59a   : > { %v1647_v10 = vadd.f32 %v1640_v2, %v3856_v59  ;;  %v1642_v50 = vpop.f32.mrb[17].mxu1 }
 0x59b   : > { %v1648_v18 = vadd.f32 %v1642_v50, %v3853_v54 }
 0x59c   : > { %3429 = vtanh.f32 %v1647_v10 }
 0x59d   : > { %v2331_v44 = vmul.f32 -1.442695, %v1648_v18 }
 0x59f   : > { %3431 = vpow2.f32 %v2331_v44 }
 0x5a6   : > { %v3430_v21 = vpop.eup %3429 }
 0x5a7   : > { %v1669_v55 = vmul.f32 %v3430_v21, %v3428_v25 }
 0x5a9   : > { %v3432_v58 = vpop.eup %3431  ;;  %v4118_v43 = vadd.f32 %v1669_v55, %v1668_v26 }
 0x5aa   : > { %v1665_v35 = vadd.f32 1.0, %v3432_v58 }
 0x5ab   : > { %3433 = vtanh.f32 %v4118_v43 }
 0x5ac   : > { %3435 = vrcp.f32 %v1665_v35 }
 0x5b5   : > { %v3434_v30 = vpop.eup %3433 }
 0x5b6   : > { %v3436_v48 = vpop.eup %3435 }
 0x5b7   : > { %v1672_v3 = vmul.f32 %v3436_v48, %v3434_v30 }
 0x5b9   : > { %2632 = vmatmul.mubr.f32.vlgmr.msra.gmra.mrb[14].mxu0 %v1672_v3  ;;  %1809 = vmatmul.mubr.f32.vlgmr.msra.gmra.mrb[18].mxu1 %v1672_v3 }
 0x5ba   : > { %3179 = vmatpush1.bf16.msra.mxu0 %v3701_v20  ;;  %1879 = vmatprep.mubr.f32.mxu0 %v3547_v0 }
 0x5bb   : > { %3181 = vmatprep.subr.bf16.mxu0 %v3708_v28  ;;  %3210 = vmatpush3.bf16.msra.mxu1 %v3808_v57 }
 0x5bc   : > { %3211 = vmatprep.subr.bf16.mxu1 %v4246_v39  ;;  %2666 = vmatprep.mubr.msk.f32.mxu1 %vm3549_vm1, %v3547_v0 }
 0x5be   : > { %3183 = vmatpush1.bf16.msra.mxu0 %v3713_v33 }
 0x5bf   : > { %3185 = vmatprep.subr.bf16.mxu0 %v3720_v38  ;;  %3213 = vmatpush3.bf16.msra.mxu1 %v3814_v61 }
 0x5c0   : > { %3214 = vmatprep.subr.bf16.mxu1 %v4246_v39 }
 0x5c2   : > { %3187 = vmatpush1.bf16.msra.mxu0 %v3726_v49 }
 0x5c3   : > { %3189 = vmatprep.subr.bf16.mxu0 %v3732_v52  ;;  %3216 = vmatpush3.bf16.msra.mxu1 %v3818_v4 }
 0x5c4   : > { %3217 = vmatprep.subr.bf16.mxu1 %v4246_v39 }
 0x5c6   : > { %3191 = vmatpush1.bf16.msra.mxu0 %v3738_v62 }
 0x5c7   : > { %3193 = vmatprep.subr.bf16.mxu0 %v3744_v1  ;;  %3219 = vmatpush3.bf16.msra.mxu1 %v3822_v9 }
 0x5c8   : > { %3220 = vmatprep.subr.bf16.mxu1 %v4246_v39 }
 0x5ca   : > { %3195 = vmatpush1.bf16.msra.mxu0 %v3750_v13 }
 0x5cb   : > { %3197 = vmatprep.subr.bf16.mxu0 %v3756_v16  ;;  %3222 = vmatpush3.bf16.msra.mxu1 %v3826_v17 }
 0x5cc   : > { %3223 = vmatprep.subr.bf16.mxu1 %v4246_v39 }
 0x5ce   : > { %3199 = vmatpush1.bf16.msra.mxu0 %v3762_v31 }
 0x5cf   : > { %3201 = vmatprep.subr.bf16.mxu0 %v3768_v34  ;;  %3225 = vmatpush3.bf16.msra.mxu1 %v3830_v23 }
 0x5d0   : > { %3226 = vmatprep.subr.bf16.mxu1 %v4246_v39 }
 0x5d2   : > { %3203 = vmatpush1.bf16.msra.mxu0 %v3774_v45 }
 0x5d3   : > { %3205 = vmatprep.subr.bf16.mxu0 %v3780_v47  ;;  %3228 = vmatpush3.bf16.msra.mxu1 %v3835_v27 }
 0x5d4   : > { %3229 = vmatprep.subr.bf16.mxu1 %v4246_v39 }
 0x5d6   : > { %3207 = vmatpush1.bf16.msra.mxu0 %v3784_v53 }
 0x5d7   : > { %3233 = vmatprep.subr.bf16.mxu0 %v3686_v7  ;;  %3231 = vmatpush3.bf16.msra.mxu1 %v3839_v36 }
 0x5d8   : > { %3265 = vmatprep.subr.bf16.mxu1 %v3695_v15 }
 0x5d9   : > { %1880 = vmatmul.mubr.f32.vlgmr.msra.gmra.mrb[16].mxu0 %v1672_v3 }
 0x5da   : > { %3235 = vmatpush1.bf16.msra.mxu0 %v3692_v11  ;;  %2049 = vmatprep.mubr.f32.mxu0 %v3547_v0 }
 0x5db   : > { %3237 = vmatprep.subr.bf16.mxu0 %v3699_v19 }
 0x5de   : > { %3239 = vmatpush1.bf16.msra.mxu0 %v3704_v24 }
 0x5df   : > { %3241 = vmatprep.subr.bf16.mxu0 %v3710_v29 }
 0x5e2   : > { %3243 = vmatpush1.bf16.msra.mxu0 %v3718_v37 }
 0x5e3   : > { %3245 = vmatprep.subr.bf16.mxu0 %v3723_v42 }
 0x5e6   : > { %3247 = vmatpush1.bf16.msra.mxu0 %v3730_v51 }
 0x5e7   : > { %3249 = vmatprep.subr.bf16.mxu0 %v3735_v56 }
 0x5ea   : > { %3251 = vmatpush1.bf16.msra.mxu0 %v3742_v63 }
 0x5eb   : > { %3253 = vmatprep.subr.bf16.mxu0 %v3747_v5 }
 0x5ee   : > { %3255 = vmatpush1.bf16.msra.mxu0 %v3754_v14 }
 0x5ef   : > { %3257 = vmatprep.subr.bf16.mxu0 %v3759_v22 }
 0x5f2   : > { %3259 = vmatpush1.bf16.msra.mxu0 %v3766_v32 }
 0x5f3   : > { %3261 = vmatprep.subr.bf16.mxu0 %v3771_v40 }
 0x5f6   : > { %3263 = vmatpush1.bf16.msra.mxu0 %v3778_v46 }
 0x5f7   : > { %3296 = vmatprep.subr.bf16.mxu0 %v4246_v39 }
 0x68c   : > { %v1739_v7 = vpop.f32.mrb[14].mxu0  ;;  %v1810_v11 = vpop.f32.mrb[18].mxu1 }
 0x68d   : > { %v1740_v15 = vadd.f32 %v3918_v41, %v1739_v7  ;;  %v2633_v19 = vpop.f32.mrb[15].mxu0  ;;  %v1812_v24 = vpop.f32.mrb[19].mxu1  ;;  %v1886_v37 = vadd.f32 %v1810_v11, %v3847_v6 }
 0x68e   : > { %v1887_v29 = vadd.f32 %v1812_v24, %v3849_v8 }
 0x68f   : > { %1743 = vst [vmem:[%s3923_s7 + $0x20] sm:$0xff] %v1740_v15  ;;  %v2332_v51 = vmul.f32 -1.442695, %v1886_v37 }
 0x690   : > { %v2333_v42 = vmul.f32 -1.442695, %v1887_v29 }
 0x692   : > { %3437 = vpow2.f32 %v2333_v42 }
 0x693   : > { %3439 = vpow2.f32 %v2332_v51 }
 0x69c   : > { %v3438_v56 = vpop.eup %3437 }
 0x69d   : > { %v3440_v63 = vpop.eup %3439  ;;  %v1899_v5 = vadd.f32 1.0, %v3438_v56 }
 0x69e   : > { %v1893_v14 = vadd.f32 1.0, %v3440_v63 }
 0x69f   : > { %3441 = vrcp.f32 %v1899_v5 }
 0x6a0   : > { %3443 = vrcp.f32 %v1893_v14 }
 0x6a9   : > { %v3442_v2 = vpop.eup %3441 }
 0x6aa   : > { %v3444_v10 = vpop.eup %3443  ;;  %v1909_v18 = vmul.f32 %v3442_v2, %v4118_v43 }
 0x6ac   : > { %v1881_v22 = vpop.f32.mrb[16].mxu0 }
 0x6ad   : > { %v1888_v32 = vadd.f32 %v1881_v22, %v3856_v59  ;;  %v1883_v40 = vpop.f32.mrb[17].mxu0 }
 0x6ae   : > { %v1889_v46 = vadd.f32 %v1883_v40, %v3853_v54 }
 0x6af   : > { %3445 = vtanh.f32 %v1888_v32 }
 0x6b0   : > { %v2334_v60 = vmul.f32 -1.442695, %v1889_v46 }
 0x6b2   : > { %3447 = vpow2.f32 %v2334_v60 }
 0x6b9   : > { %v3446_v50 = vpop.eup %3445 }
 0x6ba   : > { %v1910_v44 = vmul.f32 %v3446_v50, %v3444_v10 }
 0x6bc   : > { %v3448_v12 = vpop.eup %3447  ;;  %v4180_v25 = vadd.f32 %v1910_v44, %v1909_v18 }
 0x6bd   : > { %v1906_v21 = vadd.f32 1.0, %v3448_v12 }
 0x6be   : > { %3449 = vtanh.f32 %v4180_v25 }
 0x6bf   : > { %3451 = vrcp.f32 %v1906_v21 }
 0x6c8   : > { %v3450_v26 = vpop.eup %3449 }
 0x6c9   : > { %v3452_v55 = vpop.eup %3451 }
 0x6ca   : > { %v1913_v58 = vmul.f32 %v3452_v55, %v3450_v26 }
 0x6cc   : > { %2667 = vmatmul.mubr.f32.vlgmr.msra.gmra.mrb[20].mxu1 %v1913_v58  ;;  %2050 = vmatmul.mubr.f32.vlgmr.msra.gmra.mrb[18].mxu0 %v1913_v58 }
 0x6cd   : > { %3267 = vmatpush1.bf16.msra.mxu1 %v3701_v20  ;;  %2120 = vmatprep.mubr.f32.mxu1 %v3547_v0 }
 0x6ce   : > { %3269 = vmatprep.subr.bf16.mxu1 %v3708_v28  ;;  %3298 = vmatpush3.bf16.msra.mxu0 %v3808_v57 }
 0x6cf   : > { %3299 = vmatprep.subr.bf16.mxu0 %v4246_v39  ;;  %2701 = vmatprep.mubr.msk.f32.mxu0 %vm3549_vm1, %v3547_v0 }
 0x6d1   : > { %3271 = vmatpush1.bf16.msra.mxu1 %v3713_v33 }
 0x6d2   : > { %3273 = vmatprep.subr.bf16.mxu1 %v3720_v38  ;;  %3301 = vmatpush3.bf16.msra.mxu0 %v3814_v61 }
 0x6d3   : > { %3302 = vmatprep.subr.bf16.mxu0 %v4246_v39 }
 0x6d5   : > { %3275 = vmatpush1.bf16.msra.mxu1 %v3726_v49 }
 0x6d6   : > { %3277 = vmatprep.subr.bf16.mxu1 %v3732_v52  ;;  %3304 = vmatpush3.bf16.msra.mxu0 %v3818_v4 }
 0x6d7   : > { %3305 = vmatprep.subr.bf16.mxu0 %v4246_v39 }
 0x6d9   : > { %3279 = vmatpush1.bf16.msra.mxu1 %v3738_v62 }
 0x6da   : > { %3281 = vmatprep.subr.bf16.mxu1 %v3744_v1  ;;  %3307 = vmatpush3.bf16.msra.mxu0 %v3822_v9 }
 0x6db   : > { %3308 = vmatprep.subr.bf16.mxu0 %v4246_v39 }
 0x6dd   : > { %3283 = vmatpush1.bf16.msra.mxu1 %v3750_v13 }
 0x6de   : > { %3285 = vmatprep.subr.bf16.mxu1 %v3756_v16  ;;  %3310 = vmatpush3.bf16.msra.mxu0 %v3826_v17 }
 0x6df   : > { %3311 = vmatprep.subr.bf16.mxu0 %v4246_v39 }
 0x6e1   : > { %3287 = vmatpush1.bf16.msra.mxu1 %v3762_v31 }
 0x6e2   : > { %3289 = vmatprep.subr.bf16.mxu1 %v3768_v34  ;;  %3313 = vmatpush3.bf16.msra.mxu0 %v3830_v23 }
 0x6e3   : > { %3314 = vmatprep.subr.bf16.mxu0 %v4246_v39 }
 0x6e5   : > { %3291 = vmatpush1.bf16.msra.mxu1 %v3774_v45 }
 0x6e6   : > { %3293 = vmatprep.subr.bf16.mxu1 %v3780_v47  ;;  %3316 = vmatpush3.bf16.msra.mxu0 %v3835_v27 }
 0x6e7   : > { %3317 = vmatprep.subr.bf16.mxu0 %v4246_v39 }
 0x6e9   : > { %3295 = vmatpush1.bf16.msra.mxu1 %v3784_v53 }
 0x6ea   : > { %3319 = vmatpush3.bf16.msra.mxu0 %v3839_v36 }
 0x6ec   : > { %2121 = vmatmul.mubr.f32.vlgmr.msra.gmra.mrb[22].mxu1 %v1913_v58 }
 0x79f   : > { %v1980_v0 = vpop.f32.mrb[20].mxu1  ;;  %v2051_v20 = vpop.f32.mrb[18].mxu0 }
 0x7a0   : > { %v1981_v28 = vadd.f32 %v3918_v41, %v1980_v0  ;;  %v2668_v33 = vpop.f32.mrb[21].mxu1  ;;  %v2053_v38 = vpop.f32.mrb[19].mxu0  ;;  %v2127_v52 = vadd.f32 %v2051_v20, %v3847_v6 }
 0x7a1   : > { %v2128_v49 = vadd.f32 %v2053_v38, %v3849_v8 }
 0x7a2   : > { %1984 = vst [vmem:[%s3923_s7 + $0x28] sm:$0xff] %v1981_v28  ;;  %v2335_v1 = vmul.f32 -1.442695, %v2127_v52 }
 0x7a3   : > { %v2336_v62 = vmul.f32 -1.442695, %v2128_v49 }
 0x7a5   : > { %3453 = vpow2.f32 %v2336_v62 }
 0x7a6   : > { %3455 = vpow2.f32 %v2335_v1 }
 0x7af   : > { %v3454_v13 = vpop.eup %3453 }
 0x7b0   : > { %v3456_v16 = vpop.eup %3455  ;;  %v2140_v31 = vadd.f32 1.0, %v3454_v13 }
 0x7b1   : > { %v2134_v34 = vadd.f32 1.0, %v3456_v16 }
 0x7b2   : > { %3457 = vrcp.f32 %v2140_v31 }
 0x7b3   : > { %3459 = vrcp.f32 %v2134_v34 }
 0x7bc   : > { %v3458_v4 = vpop.eup %3457 }
 0x7bd   : > { %v3460_v9 = vpop.eup %3459  ;;  %v2150_v23 = vmul.f32 %v3458_v4, %v4180_v25 }
 0x7bf   : > { %v2122_v45 = vpop.f32.mrb[22].mxu1 }
 0x7c0   : > { %v2129_v47 = vadd.f32 %v2122_v45, %v3856_v59  ;;  %v2124_v53 = vpop.f32.mrb[23].mxu1 }
 0x7c1   : > { %v2130_v57 = vadd.f32 %v2124_v53, %v3853_v54 }
 0x7c2   : > { %3461 = vtanh.f32 %v2129_v47 }
 0x7c3   : > { %v2337_v61 = vmul.f32 -1.442695, %v2130_v57 }
 0x7c5   : > { %3463 = vpow2.f32 %v2337_v61 }
 0x7cc   : > { %v3462_v17 = vpop.eup %3461 }
 0x7cd   : > { %v2151_v27 = vmul.f32 %v3462_v17, %v3460_v9 }
 0x7cf   : > { %v3464_v36 = vpop.eup %3463  ;;  %v2152_v6 = vadd.f32 %v2151_v27, %v2150_v23 }
 0x7d0   : > { %v2147_v8 = vadd.f32 1.0, %v3464_v36 }
 0x7d1   : > { %3465 = vtanh.f32 %v2152_v6 }
 0x7d2   : > { %3467 = vrcp.f32 %v2147_v8 }
 0x7db   : > { %v3466_v59 = vpop.eup %3465 }
 0x7dc   : > { %v3468_v39 = vpop.eup %3467 }
 0x7dd   : > { %v2154_v43 = vmul.f32 %v3468_v39, %v3466_v59 }
 0x7df   : > { %2702 = vmatmul.mubr.f32.vlgmr.msra.gmra.mrb[20].mxu0 %v2154_v43 }
 0x8b2   : > { %v2221_v54 = vpop.f32.mrb[20].mxu0 }
 0x8b3   : > { %v2222_v35 = vadd.f32 %v3918_v41, %v2221_v54  ;;  %v2703_v30 = vpop.f32.mrb[21].mxu0 }
 0x8b5   : > { %2225 = vst [vmem:[%s3923_s7 + $0x30] sm:$0xff] %v2222_v35 }
 0x8b6 PF: > { %s18_s21 = sadd.s32 1, %s3539_s21  }
 0x8b7   : > { %p15_p5 = scmp.ge.s32.totalorder %s18_s21, 4  }
 0x8b9   :  { %17 = sbr.rel (!%p15_p5) target bundleno = 2 (0x2), region = 83 }
 0x8c0   :  { %2247 = vsyncpa [#allocation3], 1 }
 0x8c1   :  { %2249 = vsyncpa [#allocation3 + $0x1], 1 }
 0x8c2   :  { %2250 = vsyncpa [#allocation5], 1 }

</bundles_post_ra>
